<compile_context>
chip_gen: v7x
topology: tpu7x:2x2x1
jax: 0.10.0
libtpu: 0.0.40
codegen_flags: <defaults>
</compile_context>

<pallas_src>
import numpy as np
import jax
import jax.numpy as jnp
from jax import lax
from jax.experimental import pallas as pl
from jax.experimental.pallas import tpu as pltpu

# ---- module configuration (DownScaleBlock) -----------------------------------
GEN_DOWNSCALER_CHANNELS = [3, 64, 128, 256, 512, 512, 512, 512, 512]
CHANNELS_IN_GEN = GEN_DOWNSCALER_CHANNELS[:-1]
CHANNELS_OUT_GEN = GEN_DOWNSCALER_CHANNELS[1:]
SPATIAL_SIZE_D_DOWN = [256, 128, 64, 32, 16, 8, 4, 2, 1]

C_IDX = 2                              # conv + BN + LeakyReLU (non-trivial block)
C_IN = CHANNELS_IN_GEN[C_IDX]          # 128
C_OUT = CHANNELS_OUT_GEN[C_IDX]        # 256
K, STRIDE = 4, 2
PAD = ((SPATIAL_SIZE_D_DOWN[C_IDX + 1] - 1) * 2 + 4 - SPATIAL_SIZE_D_DOWN[C_IDX]) // 2  # == 1
EPS = 1e-5
NEG_SLOPE = 0.01                       # torch LeakyReLU default
HAS_BN = (C_IDX != 0) and (C_IDX != 7)

# Tap issue order: sublane-aligned (b == 0) taps first (free), misaligned last.
_TAP_ORDER = ((0, 0), (1, 0), (0, 1), (1, 1))


# ---- Pallas kernels -----------------------------------------------------------
def _conv_tile(xs_ref, w_ref):
    """Stride-1 2x2 conv over 4*Cin channels as 4 accumulating MXU matmuls.

    xs_ref: (1, OH+1, OW+1, 4*Cin) bf16  -- padded + space-to-depth input
    w_ref : (16*Cin, Cout)         bf16  -- rearranged conv weight
    returns (OH*OW, Cout) f32 accumulator, plus (oh, ow).
    """
    _, hs, ws, c4 = xs_ref.shape
    oh, ow = hs - 1, ws - 1
    acc = None
    for a, b in _TAP_ORDER:
        t = a * 2 + b                                         # weight row-block index
        xt = xs_ref[0, a:a + oh, b:b + ow, :].reshape(oh * ow, c4)
        wt = w_ref[t * c4:(t + 1) * c4, :]                    # (4*Cin, Cout)
        p = jnp.dot(xt, wt, preferred_element_type=jnp.float32)
        acc = p if acc is None else acc + p
    return acc, oh, ow


def conv_stats_kernel(xs_ref, w_ref, y_ref, stats_ref):
    """Conv (bias omitted: cancelled by BN) + per-image sum / sum-of-squares.

    y is stored bf16; stats stay f32 and are computed from the pre-rounding
    f32 conv result (negligible mismatch vs normalizing the rounded values).
    """
    y, oh, ow = _conv_tile(xs_ref, w_ref)                     # (OH*OW, Cout) f32
    cout = y_ref.shape[-1]
    y_ref[...] = y.astype(y_ref.dtype).reshape(1, oh, ow, cout)
    s = jnp.sum(y, axis=0, keepdims=True)                     # (1, Cout)
    ss = jnp.sum(y * y, axis=0, keepdims=True)                # (1, Cout)
    stats_ref[...] = jnp.concatenate([s, ss], axis=0)[None]   # (1, 2, Cout)


def bn_act_kernel(scale_ref, shift_ref, y_ref, o_ref):
    """Streaming per-channel FMA (precomputed BN scale/shift) + LeakyReLU."""
    cout = o_ref.shape[-1]
    z = (y_ref[...].astype(jnp.float32) * scale_ref[...].reshape(1, 1, 1, cout)
         + shift_ref[...].reshape(1, 1, 1, cout))
    o_ref[...] = jnp.maximum(z, NEG_SLOPE * z).astype(o_ref.dtype)


def conv_bias_act_kernel(xs_ref, w_ref, bias_ref, o_ref):
    """Conv + bias + LeakyReLU (only for the no-BN blocks, c_idx in {0, 7})."""
    y, oh, ow = _conv_tile(xs_ref, w_ref)
    y = y + bias_ref[...]
    y = jnp.maximum(y, NEG_SLOPE * y)
    o_ref[...] = y.astype(o_ref.dtype).reshape(1, oh, ow, o_ref.shape[-1])


# ---- wrapper (layout plumbing only: pad, space-to-depth, weight rearrange) ----
def downscale_block_forward(x_nchw, w_torch, bias, gamma, beta):
    n, cin, h, w = x_nchw.shape
    cout = w_torch.shape[0]
    oh, ow = h // 2, w // 2
    hs, ws = oh + 1, ow + 1

    # NCHW -> NHWC, pad spatially by 1, space-to-depth by 2, cast to bf16.
    # Same byte count as the input — no zero-inflated im2col in HBM.
    # TODO(synk): keep the surrounding model NHWC (+bf16) end-to-end so these
    # relayout passes and the final transpose disappear entirely.
    x = jnp.transpose(x_nchw, (0, 2, 3, 1))
    xp = jnp.pad(x, ((0, 0), (1, 1), (1, 1), (0, 0)))
    xs = xp.reshape(n, hs, 2, ws, 2, cin)
    xs = jnp.transpose(xs, (0, 1, 3, 2, 4, 5)).reshape(n, hs, ws, 4 * cin)
    xs = xs.astype(jnp.bfloat16)

    # torch Conv2d weight (Cout, Cin, 4, 4) -> (16*Cin, Cout); row order matches the
    # space-to-depth channel layout: ((a*2+b) tap)*4*Cin + (pr*2+pc)*Cin + ci,
    # with ky = 2a+pr, kx = 2b+pc.
    wk = w_torch.reshape(cout, cin, 2, 2, 2, 2)               # (co, ci, a, pr, b, pc)
    wk = jnp.transpose(wk, (2, 4, 3, 5, 1, 0))                # (a, b, pr, pc, ci, co)
    wk = wk.reshape(16 * cin, cout).astype(jnp.bfloat16)

    cparams = pltpu.CompilerParams(
        dimension_semantics=("parallel",),
        vmem_limit_bytes=32 * 1024 * 1024,
    )

    xs_spec = pl.BlockSpec((1, hs, ws, 4 * cin), lambda i: (i, 0, 0, 0))
    w_spec = pl.BlockSpec((16 * cin, cout), lambda i: (0, 0))
    y_spec = pl.BlockSpec((1, oh, ow, cout), lambda i: (i, 0, 0, 0))
    vec_spec = pl.BlockSpec((1, cout), lambda i: (0, 0))

    if HAS_BN:
        # Pass 1: conv (bias dropped — BN cancels it) + per-image f32 partial stats;
        # conv result goes to HBM as bf16.
        y_raw, stats = pl.pallas_call(
            conv_stats_kernel,
            grid=(n,),
            in_specs=[xs_spec, w_spec],
            out_specs=(y_spec, pl.BlockSpec((1, 2, cout), lambda i: (i, 0, 0))),
            out_shape=(jax.ShapeDtypeStruct((n, oh, ow, cout), jnp.bfloat16),
                       jax.ShapeDtypeStruct((n, 2, cout), jnp.float32)),
            compiler_params=cparams,
        )(xs, wk)

        # BN reduction hoisted out of the finalize grid: tiny (N,2,Cout) reduce +
        # rsqrt done once; finalize kernel only sees two (1,Cout) vectors.
        count = float(n * oh * ow)
        mean = jnp.sum(stats[:, 0, :], axis=0) / count
        var = jnp.sum(stats[:, 1, :], axis=0) / count - mean * mean  # biased batch var
        scale = gamma * lax.rsqrt(var + EPS)
        shift = beta - mean * scale

        # Pass 2 (memory-bound stream): FMA + LeakyReLU; output aliases y_raw.
        out_nhwc = pl.pallas_call(
            bn_act_kernel,
            grid=(n,),
            in_specs=[vec_spec, vec_spec, y_spec],
            out_specs=y_spec,
            out_shape=jax.ShapeDtypeStruct((n, oh, ow, cout), jnp.bfloat16),
            input_output_aliases={2: 0},
            compiler_params=cparams,
        )(scale.reshape(1, -1), shift.reshape(1, -1), y_raw)
        # TODO(synk): batch-resident variant (grid=(2, N) phase axis, conv result
        # held in VMEM scratch between phases) removes this HBM round trip on
        # v5e/v6e; on v7x keep the two-pass form and add an output-row-tile grid
        # axis (halo via pl.Element) so both TensorCores stay busy at small batch.
    else:
        out_nhwc = pl.pallas_call(
            conv_bias_act_kernel,
            grid=(n,),
            in_specs=[xs_spec, w_spec, vec_spec],
            out_specs=y_spec,
            out_shape=jax.ShapeDtypeStruct((n, oh, ow, cout), jnp.float32),
            compiler_params=cparams,
        )(xs, wk, bias.reshape(1, -1))

    # NHWC (bf16) -> NCHW f32; the cast fuses with the transpose pass.
    return jnp.transpose(out_nhwc, (0, 3, 1, 2)).astype(jnp.float32)


# ---- pure-JAX reference (sanity check) ----------------------------------------
def reference_forward(x_nchw, w_torch, bias, gamma, beta):
    y = lax.conv_general_dilated(
        x_nchw, w_torch,
        window_strides=(STRIDE, STRIDE),
        padding=[(PAD, PAD), (PAD, PAD)],
        dimension_numbers=("NCHW", "OIHW", "NCHW"),
        precision=lax.Precision.HIGHEST,
    )
    y = y + bias.reshape(1, -1, 1, 1)
    if HAS_BN:
        mean = jnp.mean(y, axis=(0, 2, 3), keepdims=True)
        var = jnp.mean((y - mean) ** 2, axis=(0, 2, 3), keepdims=True)
        y = (y - mean) * lax.rsqrt(var + EPS)
        y = y * gamma.reshape(1, -1, 1, 1) + beta.reshape(1, -1, 1, 1)
    return jnp.maximum(y, NEG_SLOPE * y)   # LeakyReLU(0.01)


if __name__ == "__main__":
    key = jax.random.PRNGKey(0)
    k_x, k_w, k_b, k_g, k_be = jax.random.split(key, 5)

    N, H, W = 2, 16, 16
    bound = 1.0 / np.sqrt(C_IN * K * K)

    x = jax.random.normal(k_x, (N, C_IN, H, W), jnp.float32)
    w_torch = jax.random.uniform(k_w, (C_OUT, C_IN, K, K), jnp.float32, -bound, bound)
    bias = jax.random.uniform(k_b, (C_OUT,), jnp.float32, -bound, bound)
    gamma = 1.0 + 0.1 * jax.random.normal(k_g, (C_OUT,), jnp.float32)
    beta = 0.1 * jax.random.normal(k_be, (C_OUT,), jnp.float32)

    out = jax.jit(downscale_block_forward)(x, w_torch, bias, gamma, beta)
    out = jax.block_until_ready(out)
    assert out.shape == (N, C_OUT, H // 2, W // 2)

    ref = jax.block_until_ready(reference_forward(x, w_torch, bias, gamma, beta))
    np.testing.assert_allclose(np.asarray(out), np.asarray(ref), rtol=5e-2, atol=5e-2)

    print("KERNEL_OK")
</pallas_src>

<mosaic_0001>
module attributes {stable_mosaic.version = 11 : i64} {
  func.func @conv_stats_kernel(%arg0: i32, %arg1: memref<1x9x9x512xbf16, #tpu.memory_space<vmem>>, %arg2: memref<2048x256xbf16, #tpu.memory_space<vmem>>, %arg3: memref<1x8x8x256xbf16, #tpu.memory_space<vmem>>, %arg4: memref<1x2x256xf32, #tpu.memory_space<vmem>>) attributes {dimension_semantics = [#tpu.dimension_semantics<parallel>], iteration_bounds = array<i64: 2>, scalar_prefetch = 0 : i64, scratch_operands = 0 : i64, tpu.core_type = #tpu.core_type<tc>, window_params = [{transform_indices = @transform_0, window_bounds = array<i64: 1, 9, 9, 512>}, {pipeline_mode = #tpu.pipeline_mode<synchronous>, transform_indices = @transform_1, window_bounds = array<i64: 2048, 256>}, {transform_indices = @transform_2, window_bounds = array<i64: 1, 8, 8, 256>}, {transform_indices = @transform_3, window_bounds = array<i64: 1, 2, 256>}]} {
    %c0 = arith.constant 0 : index
    %c0_0 = arith.constant 0 : index
    %c0_1 = arith.constant 0 : index
    %c0_2 = arith.constant 0 : index
    %0 = vector.load %arg1[%c0, %c0_0, %c0_1, %c0_2] : memref<1x9x9x512xbf16, #tpu.memory_space<vmem>>, vector<1x8x8x512xbf16>
    %1 = vector.shape_cast %0 : vector<1x8x8x512xbf16> to vector<8x8x512xbf16>
    %2 = vector.shape_cast %1 : vector<8x8x512xbf16> to vector<64x512xbf16>
    %c0_3 = arith.constant 0 : index
    %c0_4 = arith.constant 0 : index
    %3 = vector.load %arg2[%c0_3, %c0_4] : memref<2048x256xbf16, #tpu.memory_space<vmem>>, vector<512x256xbf16>
    %cst = arith.constant dense<0.000000e+00> : vector<64x256xf32>
    %4 = tpu.matmul %2, %3, %cst {dimension_numbers = #tpu.dot_dimension_numbers<[1], [0], [0], [1], [0, 0, 1, 1], [], []>} : vector<64x512xbf16>, vector<512x256xbf16>, vector<64x256xf32> -> vector<64x256xf32>
    %c0_5 = arith.constant 0 : index
    %c1 = arith.constant 1 : index
    %c0_6 = arith.constant 0 : index
    %c0_7 = arith.constant 0 : index
    %5 = vector.load %arg1[%c0_5, %c1, %c0_6, %c0_7] : memref<1x9x9x512xbf16, #tpu.memory_space<vmem>>, vector<1x8x8x512xbf16>
    %6 = vector.shape_cast %5 : vector<1x8x8x512xbf16> to vector<8x8x512xbf16>
    %7 = vector.shape_cast %6 : vector<8x8x512xbf16> to vector<64x512xbf16>
    %c1024 = arith.constant 1024 : index
    %c0_8 = arith.constant 0 : index
    %8 = vector.load %arg2[%c1024, %c0_8] : memref<2048x256xbf16, #tpu.memory_space<vmem>>, vector<512x256xbf16>
    %cst_9 = arith.constant dense<0.000000e+00> : vector<64x256xf32>
    %9 = tpu.matmul %7, %8, %cst_9 {dimension_numbers = #tpu.dot_dimension_numbers<[1], [0], [0], [1], [0, 0, 1, 1], [], []>} : vector<64x512xbf16>, vector<512x256xbf16>, vector<64x256xf32> -> vector<64x256xf32>
    %10 = arith.addf %4, %9 : vector<64x256xf32>
    %c0_10 = arith.constant 0 : index
    %c0_11 = arith.constant 0 : index
    %c1_12 = arith.constant 1 : index
    %c0_13 = arith.constant 0 : index
    %11 = vector.load %arg1[%c0_10, %c0_11, %c1_12, %c0_13] : memref<1x9x9x512xbf16, #tpu.memory_space<vmem>>, vector<1x8x8x512xbf16>
    %12 = vector.shape_cast %11 : vector<1x8x8x512xbf16> to vector<8x8x512xbf16>
    %13 = vector.shape_cast %12 : vector<8x8x512xbf16> to vector<64x512xbf16>
    %c512 = arith.constant 512 : index
    %c0_14 = arith.constant 0 : index
    %14 = vector.load %arg2[%c512, %c0_14] : memref<2048x256xbf16, #tpu.memory_space<vmem>>, vector<512x256xbf16>
    %cst_15 = arith.constant dense<0.000000e+00> : vector<64x256xf32>
    %15 = tpu.matmul %13, %14, %cst_15 {dimension_numbers = #tpu.dot_dimension_numbers<[1], [0], [0], [1], [0, 0, 1, 1], [], []>} : vector<64x512xbf16>, vector<512x256xbf16>, vector<64x256xf32> -> vector<64x256xf32>
    %16 = arith.addf %10, %15 : vector<64x256xf32>
    %c0_16 = arith.constant 0 : index
    %c1_17 = arith.constant 1 : index
    %c1_18 = arith.constant 1 : index
    %c0_19 = arith.constant 0 : index
    %17 = vector.load %arg1[%c0_16, %c1_17, %c1_18, %c0_19] : memref<1x9x9x512xbf16, #tpu.memory_space<vmem>>, vector<1x8x8x512xbf16>
    %18 = vector.shape_cast %17 : vector<1x8x8x512xbf16> to vector<8x8x512xbf16>
    %19 = vector.shape_cast %18 : vector<8x8x512xbf16> to vector<64x512xbf16>
    %c1536 = arith.constant 1536 : index
    %c0_20 = arith.constant 0 : index
    %20 = vector.load %arg2[%c1536, %c0_20] : memref<2048x256xbf16, #tpu.memory_space<vmem>>, vector<512x256xbf16>
    %cst_21 = arith.constant dense<0.000000e+00> : vector<64x256xf32>
    %21 = tpu.matmul %19, %20, %cst_21 {dimension_numbers = #tpu.dot_dimension_numbers<[1], [0], [0], [1], [0, 0, 1, 1], [], []>} : vector<64x512xbf16>, vector<512x256xbf16>, vector<64x256xf32> -> vector<64x256xf32>
    %22 = arith.addf %16, %21 : vector<64x256xf32>
    %23 = arith.truncf %22 : vector<64x256xf32> to vector<64x256xbf16>
    %24 = vector.shape_cast %23 : vector<64x256xbf16> to vector<1x8x8x256xbf16>
    %c0_22 = arith.constant 0 : index
    %c0_23 = arith.constant 0 : index
    %c0_24 = arith.constant 0 : index
    %c0_25 = arith.constant 0 : index
    %25 = vector.load %arg3[%c0_22, %c0_23, %c0_24, %c0_25] : memref<1x8x8x256xbf16, #tpu.memory_space<vmem>>, vector<1x8x8x256xbf16>
    tpu.vector_store %arg3[%c0_22, %c0_23, %c0_24, %c0_25], %24 {strides = array<i32>} : memref<1x8x8x256xbf16, #tpu.memory_space<vmem>>, vector<1x8x8x256xbf16>,
    %cst_26 = arith.constant dense<0.000000e+00> : vector<256xf32>
    %26 = vector.multi_reduction <add>, %22, %cst_26 [0] : vector<64x256xf32> to vector<256xf32>
    %27 = vector.shape_cast %26 : vector<256xf32> to vector<1x256xf32>
    %28 = arith.mulf %22, %22 : vector<64x256xf32>
    %cst_27 = arith.constant dense<0.000000e+00> : vector<256xf32>
    %29 = vector.multi_reduction <add>, %28, %cst_27 [0] : vector<64x256xf32> to vector<256xf32>
    %30 = vector.shape_cast %29 : vector<256xf32> to vector<1x256xf32>
    %31 = tpu.concatenate %27, %30 in 0 : vector<1x256xf32>, vector<1x256xf32> -> vector<2x256xf32>
    %32 = vector.shape_cast %31 : vector<2x256xf32> to vector<1x2x256xf32>
    %c0_28 = arith.constant 0 : index
    %c0_29 = arith.constant 0 : index
    %c0_30 = arith.constant 0 : index
    %33 = vector.load %arg4[%c0_28, %c0_29, %c0_30] : memref<1x2x256xf32, #tpu.memory_space<vmem>>, vector<1x2x256xf32>
    tpu.vector_store %arg4[%c0_28, %c0_29, %c0_30], %32 {strides = array<i32>} : memref<1x2x256xf32, #tpu.memory_space<vmem>>, vector<1x2x256xf32>,
    return
  }
  func.func @transform_0(%arg0: i32) -> (i32, i32, i32, i32) {
    %c0_i32 = arith.constant 0 : i32
    %c0_i32_0 = arith.constant 0 : i32
    %c0_i32_1 = arith.constant 0 : i32
    %c0_i32_2 = arith.constant 0 : i32
    return %arg0, %c0_i32, %c0_i32_0, %c0_i32_1 : i32, i32, i32, i32
  }
  func.func @transform_1(%arg0: i32) -> (i32, i32) {
    %c0_i32 = arith.constant 0 : i32
    %c0_i32_0 = arith.constant 0 : i32
    %c0_i32_1 = arith.constant 0 : i32
    return %c0_i32, %c0_i32_0 : i32, i32
  }
  func.func @transform_2(%arg0: i32) -> (i32, i32, i32, i32) {
    %c0_i32 = arith.constant 0 : i32
    %c0_i32_0 = arith.constant 0 : i32
    %c0_i32_1 = arith.constant 0 : i32
    %c0_i32_2 = arith.constant 0 : i32
    return %arg0, %c0_i32, %c0_i32_0, %c0_i32_1 : i32, i32, i32, i32
  }
  func.func @transform_3(%arg0: i32) -> (i32, i32, i32) {
    %c0_i32 = arith.constant 0 : i32
    %c0_i32_0 = arith.constant 0 : i32
    %c0_i32_1 = arith.constant 0 : i32
    return %arg0, %c0_i32, %c0_i32_0 : i32, i32, i32
  }
}

module attributes {stable_mosaic.version = 11 : i64} {
  func.func @bn_act_kernel(%arg0: i32, %arg1: memref<1x256xf32, #tpu.memory_space<vmem>>, %arg2: memref<1x256xf32, #tpu.memory_space<vmem>>, %arg3: memref<1x8x8x256xbf16, #tpu.memory_space<vmem>>, %arg4: memref<1x8x8x256xbf16, #tpu.memory_space<vmem>>) attributes {dimension_semantics = [#tpu.dimension_semantics<parallel>], iteration_bounds = array<i64: 2>, scalar_prefetch = 0 : i64, scratch_operands = 0 : i64, tpu.core_type = #tpu.core_type<tc>, window_params = [{pipeline_mode = #tpu.pipeline_mode<synchronous>, transform_indices = @transform_0, window_bounds = array<i64: 1, 256>}, {pipeline_mode = #tpu.pipeline_mode<synchronous>, transform_indices = @transform_1, window_bounds = array<i64: 1, 256>}, {transform_indices = @transform_2, window_bounds = array<i64: 1, 8, 8, 256>}, {transform_indices = @transform_3, window_bounds = array<i64: 1, 8, 8, 256>}]} {
    %c0 = arith.constant 0 : index
    %c0_0 = arith.constant 0 : index
    %c0_1 = arith.constant 0 : index
    %c0_2 = arith.constant 0 : index
    %0 = vector.load %arg3[%c0, %c0_0, %c0_1, %c0_2] : memref<1x8x8x256xbf16, #tpu.memory_space<vmem>>, vector<1x8x8x256xbf16>
    %1 = arith.extf %0 : vector<1x8x8x256xbf16> to vector<1x8x8x256xf32>
    %c0_3 = arith.constant 0 : index
    %c0_4 = arith.constant 0 : index
    %2 = vector.load %arg1[%c0_3, %c0_4] : memref<1x256xf32, #tpu.memory_space<vmem>>, vector<1x256xf32>
    %3 = vector.shape_cast %2 : vector<1x256xf32> to vector<1x1x1x256xf32>
    %4 = vector.broadcast %3 : vector<1x1x1x256xf32> to vector<1x8x8x256xf32>
    %5 = arith.mulf %1, %4 : vector<1x8x8x256xf32>
    %c0_5 = arith.constant 0 : index
    %c0_6 = arith.constant 0 : index
    %6 = vector.load %arg2[%c0_5, %c0_6] : memref<1x256xf32, #tpu.memory_space<vmem>>, vector<1x256xf32>
    %7 = vector.shape_cast %6 : vector<1x256xf32> to vector<1x1x1x256xf32>
    %8 = vector.broadcast %7 : vector<1x1x1x256xf32> to vector<1x8x8x256xf32>
    %9 = arith.addf %5, %8 : vector<1x8x8x256xf32>
    %cst = arith.constant 0.00999999977 : f32
    %10 = vector.broadcast %cst : f32 to vector<1x8x8x256xf32>
    %11 = arith.mulf %10, %9 : vector<1x8x8x256xf32>
    %12 = arith.maximumf %9, %11 : vector<1x8x8x256xf32>
    %13 = arith.truncf %12 : vector<1x8x8x256xf32> to vector<1x8x8x256xbf16>
    %c0_7 = arith.constant 0 : index
    %c0_8 = arith.constant 0 : index
    %c0_9 = arith.constant 0 : index
    %c0_10 = arith.constant 0 : index
    %14 = vector.load %arg4[%c0_7, %c0_8, %c0_9, %c0_10] : memref<1x8x8x256xbf16, #tpu.memory_space<vmem>>, vector<1x8x8x256xbf16>
    tpu.vector_store %arg4[%c0_7, %c0_8, %c0_9, %c0_10], %13 {strides = array<i32>} : memref<1x8x8x256xbf16, #tpu.memory_space<vmem>>, vector<1x8x8x256xbf16>,
    return
  }
  func.func @transform_0(%arg0: i32) -> (i32, i32) {
    %c0_i32 = arith.constant 0 : i32
    %c0_i32_0 = arith.constant 0 : i32
    %c0_i32_1 = arith.constant 0 : i32
    return %c0_i32, %c0_i32_0 : i32, i32
  }
  func.func @transform_1(%arg0: i32) -> (i32, i32) {
    %c0_i32 = arith.constant 0 : i32
    %c0_i32_0 = arith.constant 0 : i32
    %c0_i32_1 = arith.constant 0 : i32
    return %c0_i32, %c0_i32_0 : i32, i32
  }
  func.func @transform_2(%arg0: i32) -> (i32, i32, i32, i32) {
    %c0_i32 = arith.constant 0 : i32
    %c0_i32_0 = arith.constant 0 : i32
    %c0_i32_1 = arith.constant 0 : i32
    %c0_i32_2 = arith.constant 0 : i32
    return %arg0, %c0_i32, %c0_i32_0, %c0_i32_1 : i32, i32, i32, i32
  }
  func.func @transform_3(%arg0: i32) -> (i32, i32, i32, i32) {
    %c0_i32 = arith.constant 0 : i32
    %c0_i32_0 = arith.constant 0 : i32
    %c0_i32_1 = arith.constant 0 : i32
    %c0_i32_2 = arith.constant 0 : i32
    return %arg0, %c0_i32, %c0_i32_0, %c0_i32_1 : i32, i32, i32, i32
  }
}

</mosaic_0001>

<bundles_post_ra>
// kernel: downscale_block_forward.3
= control target key start
LH: loop header
LB: loop body
LE: loop exit
PB: predicated region body
PF: predicated region fallthrough
CT: control target
= control target key end

     0   :  { %s475_s12 = smov 0   ;;  %s535_s0 = inlined_call_operand.vmem [shape: f32[1,256], index: 0, kind: input, shape index: {}]   ;;  %s536_s1 = inlined_call_operand.vmem [shape: f32[1,256], index: 1, kind: input, shape index: {}]   ;;  %s537_s2 = inlined_call_operand.vmem [shape: bf16[2,8,8,256], index: 2, kind: input, shape index: {}, may-alias: {2,3}]   ;;  %s538_s3 = inlined_call_operand.vmem [shape: bf16[2,8,8,256], index: 3, kind: output, shape index: {}, may-alias: {2,3}]  }
   0x1 LB: > { %s410_s13 = sadd.s32 4294967295, %s453_s12   ;;  %p414_p0 = scmp.ge.s32.totalorder %s453_s12, 1  ;;  %s453_s12 = sphi %s475_s12, %s13_s12  }
   0x2   : > { %p137_p1 = scmp.lt.s32.totalorder %s453_s12, 3 }
   0x4   : > { %p138_p2 = pnand %p414_p0, %p137_p1 }
   0x5   : > { %p161_p3 = scmp.lt.s32.totalorder (!%p138_p2), %s410_s13, 1  ;;  %v197_v0 = vlaneseq (!%p138_p2)  ;;  %v195_v2 = vld [vmem:[%s535_s0] sm:$0x3] (!%p138_p2) }
   0x6   : > { %141 = sbr.rel (%p138_p2) target bundleno = 44 (0x2c), region = 32  ;;  %v223_v3 = vld [vmem:[%s536_s1] sm:$0x3] (!%p138_p2) }
   0x7   : > { %v198_v1 = vshrl.u32 (!%p138_p2), %v197_v0, 7 }
   0x9   : > { %v199_v4 = vsub.s32 (!%p138_p2), 0, %v198_v1  ;;  %v203_v5 = vsub.s32 (!%p138_p2), 1, %v198_v1 }
   0xb   : > { %v200_v9 = vrot.slane (!%p138_p2), %v195_v2, %v199_v4  ;;  %v204_v10 = vrot.slane (!%p138_p2), %v195_v2, %v203_v5  ;;  %v497_v11 = vrot.slane (!%p138_p2), %v223_v3, %v199_v4  ;;  %v499_v12 = vrot.slane (!%p138_p2), %v223_v3, %v203_v5 }
   0xd   : > { %s540_s13 = smov (!%p161_p3, %s410_s13), 1 }
   0xe   : > { %s429_s18 = sshll.u32 %s540_s13, 6 }
   0xf   : > { %s165_s21 = scalar_lea.vmem %s537_s2, %s429_s18  ;;  %s516_s24 = scalar_lea.vmem %s538_s3, %s429_s18 }
  0x10   : > { %v171_v6 = vld [vmem:[%s165_s21] sm:$0xff]  ;;  %v172_v7 = vld [vmem:[%s165_s21 + $0x8] sm:$0xff]  ;;  %v173_v8 = vld [vmem:[%s165_s21 + $0x10] sm:$0xff] }
  0x11   : > { %v174_v13 = vld [vmem:[%s165_s21 + $0x18] sm:$0xff]  ;;  %v175_v14 = vld [vmem:[%s165_s21 + $0x20] sm:$0xff]  ;;  %v176_v15 = vld [vmem:[%s165_s21 + $0x28] sm:$0xff]  ;;  %v179_v16 = vunpack.c.l.bf16 %v171_v6  ;;  %v180_v17 = vunpack.c.h.bf16 %v171_v6  ;;  %v181_v18 = vunpack.c.l.bf16 %v172_v7  ;;  %v182_v19 = vunpack.c.h.bf16 %v172_v7 }
  0x12   : > { %v177_v20 = vld [vmem:[%s165_s21 + $0x30] sm:$0xff]  ;;  %v178_v21 = vld [vmem:[%s165_s21 + $0x38] sm:$0xff]  ;;  %v183_v22 = vunpack.c.l.bf16 %v173_v8  ;;  %v184_v23 = vunpack.c.h.bf16 %v173_v8  ;;  %v185_v24 = vunpack.c.l.bf16 %v174_v13  ;;  %v186_v25 = vunpack.c.h.bf16 %v174_v13 }
  0x13   : > { %v187_v26 = vunpack.c.l.bf16 %v175_v14  ;;  %v188_v27 = vunpack.c.h.bf16 %v175_v14  ;;  %v189_v28 = vunpack.c.l.bf16 %v176_v15  ;;  %v190_v29 = vunpack.c.h.bf16 %v176_v15 }
  0x14   : > { %v191_v30 = vunpack.c.l.bf16 %v177_v20  ;;  %v192_v31 = vunpack.c.h.bf16 %v177_v20  ;;  %v193_v32 = vunpack.c.l.bf16 %v178_v21  ;;  %v194_v33 = vunpack.c.h.bf16 %v178_v21 }
  0x15   : > { %v207_v34 = vmul.f32 %v200_v9, %v179_v16  ;;  %v208_v35 = vmul.f32 %v204_v10, %v180_v17  ;;  %v209_v36 = vmul.f32 %v200_v9, %v181_v18  ;;  %v210_v37 = vmul.f32 %v204_v10, %v182_v19 }
  0x16   : > { %v211_v38 = vmul.f32 %v200_v9, %v183_v22  ;;  %v212_v39 = vmul.f32 %v204_v10, %v184_v23  ;;  %v213_v40 = vmul.f32 %v200_v9, %v185_v24  ;;  %v214_v41 = vmul.f32 %v204_v10, %v186_v25 }
  0x17   : > { %v215_v42 = vmul.f32 %v200_v9, %v187_v26  ;;  %v216_v43 = vmul.f32 %v204_v10, %v188_v27  ;;  %v217_v44 = vmul.f32 %v200_v9, %v189_v28  ;;  %v218_v45 = vmul.f32 %v204_v10, %v190_v29 }
  0x18   : > { %v219_v46 = vmul.f32 %v200_v9, %v191_v30  ;;  %v220_v47 = vmul.f32 %v204_v10, %v192_v31  ;;  %v221_v48 = vmul.f32 %v200_v9, %v193_v32  ;;  %v222_v49 = vmul.f32 %v204_v10, %v194_v33 }
  0x19   : > { %v235_v50 = vadd.f32 %v497_v11, %v207_v34  ;;  %v236_v51 = vadd.f32 %v499_v12, %v208_v35  ;;  %v237_v52 = vadd.f32 %v497_v11, %v209_v36  ;;  %v238_v53 = vadd.f32 %v499_v12, %v210_v37 }
  0x1a   : > { %v239_v54 = vadd.f32 %v497_v11, %v211_v38  ;;  %v240_v55 = vadd.f32 %v499_v12, %v212_v39  ;;  %v241_v56 = vadd.f32 %v497_v11, %v213_v40  ;;  %v242_v57 = vadd.f32 %v499_v12, %v214_v41 }
  0x1b   : > { %v251_v58 = vmul.f32 0.01, %v235_v50  ;;  %v252_v59 = vmul.f32 0.01, %v236_v51  ;;  %v253_v60 = vmul.f32 0.01, %v237_v52  ;;  %v243_v61 = vadd.f32 %v497_v11, %v215_v42 }
  0x1c   : > { %v254_v62 = vmul.f32 0.01, %v238_v53  ;;  %v255_v63 = vmul.f32 0.01, %v239_v54  ;;  %v256_v0 = vmul.f32 0.01, %v240_v55  ;;  %v244_v1 = vadd.f32 %v499_v12, %v216_v43 }
  0x1d   : > { %v267_v2 = vmax.f32 %v235_v50, %v251_v58  ;;  %v268_v3 = vmax.f32 %v236_v51, %v252_v59  ;;  %v269_v4 = vmax.f32 %v237_v52, %v253_v60  ;;  %v257_v5 = vmul.f32 0.01, %v241_v56 }
  0x1e   : > { %v270_v6 = vmax.f32 %v238_v53, %v254_v62  ;;  %v271_v7 = vmax.f32 %v239_v54, %v255_v63  ;;  %v272_v8 = vmax.f32 %v240_v55, %v256_v0  ;;  %v258_v9 = vmul.f32 0.01, %v242_v57 }
  0x1f   : > { %v431_v10 = vpack.c.bf16 %v268_v3, %v267_v2  ;;  %v273_v13 = vmax.f32 %v241_v56, %v257_v5  ;;  %v259_v14 = vmul.f32 0.01, %v243_v61  ;;  %v260_v15 = vmul.f32 0.01, %v244_v1 }
  0x20   : > { %v432_v16 = vpack.c.bf16 %v270_v6, %v269_v4  ;;  %v433_v17 = vpack.c.bf16 %v272_v8, %v271_v7  ;;  %v274_v18 = vmax.f32 %v242_v57, %v258_v9  ;;  %v245_v19 = vadd.f32 %v497_v11, %v217_v44 }
  0x21   : > { %347 = vst [vmem:[%s516_s24] sm:$0xff] %v431_v10  ;;  %v275_v20 = vmax.f32 %v243_v61, %v259_v14  ;;  %v276_v21 = vmax.f32 %v244_v1, %v260_v15  ;;  %v246_v22 = vadd.f32 %v499_v12, %v218_v45  ;;  %v247_v23 = vadd.f32 %v497_v11, %v219_v46 }
  0x22   : > { %348 = vst [vmem:[%s516_s24 + $0x8] sm:$0xff] %v432_v16  ;;  %349 = vst [vmem:[%s516_s24 + $0x10] sm:$0xff] %v433_v17  ;;  %v434_v24 = vpack.c.bf16 %v274_v18, %v273_v13  ;;  %v261_v25 = vmul.f32 0.01, %v245_v19  ;;  %v248_v26 = vadd.f32 %v499_v12, %v220_v47  ;;  %v249_v27 = vadd.f32 %v497_v11, %v221_v48 }
  0x23   : > { %v435_v28 = vpack.c.bf16 %v276_v21, %v275_v20  ;;  %v262_v29 = vmul.f32 0.01, %v246_v22  ;;  %v263_v30 = vmul.f32 0.01, %v247_v23  ;;  %v250_v31 = vadd.f32 %v499_v12, %v222_v49 }
  0x24   : > { %350 = vst [vmem:[%s516_s24 + $0x18] sm:$0xff] %v434_v24  ;;  %v277_v32 = vmax.f32 %v245_v19, %v261_v25  ;;  %v264_v33 = vmul.f32 0.01, %v248_v26  ;;  %v265_v34 = vmul.f32 0.01, %v249_v27 }
  0x25   : > { %351 = vst [vmem:[%s516_s24 + $0x20] sm:$0xff] %v435_v28  ;;  %v278_v35 = vmax.f32 %v246_v22, %v262_v29  ;;  %v279_v36 = vmax.f32 %v247_v23, %v263_v30  ;;  %v266_v37 = vmul.f32 0.01, %v250_v31 }
  0x26   : > { %v280_v38 = vmax.f32 %v248_v26, %v264_v33  ;;  %v281_v39 = vmax.f32 %v249_v27, %v265_v34 }
  0x27   : > { %v436_v40 = vpack.c.bf16 %v278_v35, %v277_v32  ;;  %v282_v11 = vmax.f32 %v250_v31, %v266_v37 }
  0x28   : > { %v437_v41 = vpack.c.bf16 %v280_v38, %v279_v36 }
  0x29   : > { %352 = vst [vmem:[%s516_s24 + $0x28] sm:$0xff] %v436_v40  ;;  %v438_v42 = vpack.c.bf16 %v282_v11, %v281_v39 }
  0x2a   : > { %353 = vst [vmem:[%s516_s24 + $0x30] sm:$0xff] %v437_v41 }
  0x2b   : > { %354 = vst [vmem:[%s516_s24 + $0x38] sm:$0xff] %v438_v42 }
  0x2c PF: > { %s13_s12 = sadd.s32 1, %s453_s12  }
  0x2d   : > { %p10_p4 = scmp.ge.s32.totalorder %s13_s12, 4  }
  0x2f   :  { %12 = sbr.rel (!%p10_p4) target bundleno = 1 (0x1), region = 62 }

// kernel: downscale_block_forward.2
= control target key start
LH: loop header
LB: loop body
LE: loop exit
PB: predicated region body
PF: predicated region fallthrough
CT: control target
= control target key end

     0   :  { %s4333_s12 = smov 0   ;;  %s5465_s0 = inlined_call_operand.vmem [shape: bf16[2,9,9,512], index: 0, kind: input, shape index: {}]   ;;  %s5466_s1 = inlined_call_operand.vmem [shape: bf16[2048,256], index: 1, kind: input, shape index: {}]   ;;  %s5467_s2 = inlined_call_operand.vmem [shape: bf16[2,8,8,256], index: 2, kind: output, shape index: {0}]   ;;  %s5468_s3 = inlined_call_operand.vmem [shape: f32[2,2,256], index: 3, kind: output, shape index: {1}]  }
   0x1 LB: > { %s3399_s13 = sadd.s32 4294967295, %s4311_s12   ;;  %p3403_p0 = scmp.ge.s32.totalorder %s4311_s12, 1  ;;  %s4311_s12 = sphi %s4333_s12, %s14_s12  }
   0x2   : > { %p140_p1 = scmp.lt.s32.totalorder %s4311_s12, 3 }
   0x4   : > { %p141_p2 = pnand %p3403_p0, %p140_p1 }
   0x5   : > { %v3919_v0 = vld [vmem:[%s5466_s1 + $0x404] ss:$8 sps:$4 sm:$0xff] (!%p141_p2)   ;;  %v3923_v2 = vld [vmem:[%s5466_s1 + $0x400] ss:$8 sps:$4 sm:$0xff] (!%p141_p2)   ;;  %v3925_v4 = vld [vmem:[%s5466_s1 + $0x414] ss:$8 sps:$4 sm:$0xff] (!%p141_p2)  }
   0x6   : > { %144 = sbr.rel (%p141_p2) target bundleno = 524 (0x20c), region = 28  ;;  %v3921_v1 = vld [vmem:[%s5466_s1 + $0x204] ss:$8 sps:$4 sm:$0xff] (!%p141_p2)   ;;  %745 = vmatprep.subr.bf16.mxu1 (!%p141_p2), %v3919_v0  ;;  %v3924_v3 = vld [vmem:[%s5466_s1 + $0x200] ss:$8 sps:$4 sm:$0xff] (!%p141_p2)   ;;  %p169_p3 = scmp.lt.s32.totalorder (!%p141_p2), %s3399_s13, 1 }
   0x7   : > { %2144 = vmatprep.subr.bf16.mxu0 (!%p141_p2), %v3921_v1  ;;  %746 = vmatpush1.bf16.msra.mxu1 (!%p141_p2), %v3923_v2  ;;  %v3927_v5 = vld [vmem:[%s5466_s1 + $0x214] ss:$8 sps:$4 sm:$0xff] (!%p141_p2)   ;;  %v3929_v6 = vld [vmem:[%s5466_s1 + $0x410] ss:$8 sps:$4 sm:$0xff] (!%p141_p2)   ;;  %v3931_v8 = vld [vmem:[%s5466_s1 + $0x424] ss:$8 sps:$4 sm:$0xff] (!%p141_p2)  }
   0x8   : > { %2145 = vmatpush1.bf16.msra.mxu0 (!%p141_p2), %v3924_v3  ;;  %747 = vmatprep.subr.bf16.mxu1 (!%p141_p2), %v3925_v4  ;;  %v3930_v7 = vld [vmem:[%s5466_s1 + $0x210] ss:$8 sps:$4 sm:$0xff] (!%p141_p2)   ;;  %v3933_v9 = vld [vmem:[%s5466_s1 + $0x224] ss:$8 sps:$4 sm:$0xff] (!%p141_p2)   ;;  %v3935_v10 = vld [vmem:[%s5466_s1 + $0x420] ss:$8 sps:$4 sm:$0xff] (!%p141_p2)  }
   0x9   : > { %2146 = vmatprep.subr.bf16.mxu0 (!%p141_p2), %v3927_v5  ;;  %v3936_v11 = vld [vmem:[%s5466_s1 + $0x220] ss:$8 sps:$4 sm:$0xff] (!%p141_p2)   ;;  %v3937_v12 = vld [vmem:[%s5466_s1 + $0x434] ss:$8 sps:$4 sm:$0xff] (!%p141_p2)   ;;  %v3941_v14 = vld [vmem:[%s5466_s1 + $0x430] ss:$8 sps:$4 sm:$0xff] (!%p141_p2)  }
   0xa   : > { %v3939_v13 = vld [vmem:[%s5466_s1 + $0x234] ss:$8 sps:$4 sm:$0xff] (!%p141_p2)   ;;  %v3942_v15 = vld [vmem:[%s5466_s1 + $0x230] ss:$8 sps:$4 sm:$0xff] (!%p141_p2)   ;;  %v3943_v16 = vld [vmem:[%s5466_s1 + $0x444] ss:$8 sps:$4 sm:$0xff] (!%p141_p2)  }
   0xb   : > { %748 = vmatpush1.bf16.msra.mxu1 (!%p141_p2), %v3929_v6  ;;  %v3945_v17 = vld [vmem:[%s5466_s1 + $0x244] ss:$8 sps:$4 sm:$0xff] (!%p141_p2)   ;;  %v3947_v18 = vld [vmem:[%s5466_s1 + $0x440] ss:$8 sps:$4 sm:$0xff] (!%p141_p2)   ;;  %v3949_v20 = vld [vmem:[%s5466_s1 + $0x454] ss:$8 sps:$4 sm:$0xff] (!%p141_p2)  }
   0xc   : > { %2147 = vmatpush1.bf16.msra.mxu0 (!%p141_p2), %v3930_v7  ;;  %749 = vmatprep.subr.bf16.mxu1 (!%p141_p2), %v3931_v8  ;;  %v3948_v19 = vld [vmem:[%s5466_s1 + $0x240] ss:$8 sps:$4 sm:$0xff] (!%p141_p2)   ;;  %v3951_v21 = vld [vmem:[%s5466_s1 + $0x254] ss:$8 sps:$4 sm:$0xff] (!%p141_p2)   ;;  %v3953_v22 = vld [vmem:[%s5466_s1 + $0x450] ss:$8 sps:$4 sm:$0xff] (!%p141_p2)  }
   0xd   : > { %2148 = vmatprep.subr.bf16.mxu0 %v3933_v9  ;;  %v3954_v23 = vld [vmem:[%s5466_s1 + $0x250] ss:$8 sps:$4 sm:$0xff]   ;;  %v3955_v24 = vld [vmem:[%s5466_s1 + $0x464] ss:$8 sps:$4 sm:$0xff]   ;;  %v3959_v26 = vld [vmem:[%s5466_s1 + $0x460] ss:$8 sps:$4 sm:$0xff]  }
   0xe   : > { %v3957_v25 = vld [vmem:[%s5466_s1 + $0x264] ss:$8 sps:$4 sm:$0xff]   ;;  %v3960_v27 = vld [vmem:[%s5466_s1 + $0x260] ss:$8 sps:$4 sm:$0xff]   ;;  %v3961_v28 = vld [vmem:[%s5466_s1 + $0x474] ss:$8 sps:$4 sm:$0xff]  }
   0xf   : > { %750 = vmatpush1.bf16.msra.mxu1 %v3935_v10  ;;  %v3963_v29 = vld [vmem:[%s5466_s1 + $0x274] ss:$8 sps:$4 sm:$0xff]   ;;  %v3965_v30 = vld [vmem:[%s5466_s1 + $0x470] ss:$8 sps:$4 sm:$0xff]   ;;  %v3967_v32 = vld [vmem:[%s5466_s1 + $0x484] ss:$8 sps:$4 sm:$0xff]  }
  0x10   : > { %2149 = vmatpush1.bf16.msra.mxu0 %v3936_v11  ;;  %751 = vmatprep.subr.bf16.mxu1 %v3937_v12  ;;  %v3966_v31 = vld [vmem:[%s5466_s1 + $0x270] ss:$8 sps:$4 sm:$0xff]   ;;  %v3969_v33 = vld [vmem:[%s5466_s1 + $0x284] ss:$8 sps:$4 sm:$0xff]   ;;  %v3971_v34 = vld [vmem:[%s5466_s1 + $0x480] ss:$8 sps:$4 sm:$0xff]  }
  0x11   : > { %2150 = vmatprep.subr.bf16.mxu0 %v3939_v13  ;;  %v3972_v35 = vld [vmem:[%s5466_s1 + $0x280] ss:$8 sps:$4 sm:$0xff]   ;;  %s5472_s13 = smov (!%p169_p3, %s3399_s13), 1  ;;  %v3973_v36 = vld [vmem:[%s5466_s1 + $0x494] ss:$8 sps:$4 sm:$0xff]   ;;  %vm3296_vm3 = vcmask 1040384  }
  0x12   : > { %v3975_v37 = vld [vmem:[%s5466_s1 + $0x294] ss:$8 sps:$4 sm:$0xff]   ;;  %v3977_v38 = vld [vmem:[%s5466_s1 + $0x490] ss:$8 sps:$4 sm:$0xff]   ;;  %s3910_s17 = smul.u32 288, %s5472_s13  ;;  %s3788_s22 = sshll.u32 %s5472_s13, 6 }
  0x13   : > { %752 = vmatpush1.bf16.msra.mxu1 %v3941_v14  ;;  %v3978_v39 = vld [vmem:[%s5466_s1 + $0x290] ss:$8 sps:$4 sm:$0xff]   ;;  %v3979_v40 = vld [vmem:[%s5466_s1 + $0x4a4] ss:$8 sps:$4 sm:$0xff]   ;;  %v3983_v42 = vld [vmem:[%s5466_s1 + $0x4a0] ss:$8 sps:$4 sm:$0xff]   ;;  %s5448_s24 = scalar_lea.vmem %s5467_s2, %s3788_s22 }
  0x14   : > { %2151 = vmatpush1.bf16.msra.mxu0 %v3942_v15  ;;  %753 = vmatprep.subr.bf16.mxu1 %v3943_v16  ;;  %v3981_v41 = vld [vmem:[%s5466_s1 + $0x2a4] ss:$8 sps:$4 sm:$0xff]   ;;  %v3984_v43 = vld [vmem:[%s5466_s1 + $0x2a0] ss:$8 sps:$4 sm:$0xff]   ;;  %s4483_s30 = scalar_lea.vmem %s5465_s0, %s3910_s17  ;;  %v3985_v44 = vld [vmem:[%s5466_s1 + $0x4b4] ss:$8 sps:$4 sm:$0xff]  }
  0x15   : > { %2152 = vmatprep.subr.bf16.mxu0 %v3945_v17  ;;  %vm1469_vm0 = vsmask.f32 3328  ;;  %v3987_v45 = vld [vmem:[%s5466_s1 + $0x2b4] ss:$8 sps:$4 sm:$0xff]   ;;  %vm1470_vm1 = vsmask.f32 7440 }
  0x16   : > { %v3989_v46 = vld [vmem:[%s5466_s1 + $0x4b0] ss:$8 sps:$4 sm:$0xff]   ;;  %v4498_v48 = vld [vmem:[%s4483_s30 + $0x20] sm:$0xff]  ;;  %v3997_v2 = vld [vmem:[%s5466_s1 + $0x4d4] ss:$8 sps:$4 sm:$0xff]   ;;  %s3789_s25 = sshll.u32 %s5472_s13, 2 }
  0x17   : > { %754 = vmatpush1.bf16.msra.mxu1 %v3947_v18  ;;  %v3990_v47 = vld [vmem:[%s5466_s1 + $0x2b0] ss:$8 sps:$4 sm:$0xff]   ;;  %v4501_v49 = vld [vmem:[%s4483_s30 + $0x40] sm:$0xff]  ;;  %v1501_v50 = vshrl.u32 %v4498_v48, 16  ;;  %v1504_v51 = vshll.u32 %v4498_v48, 16  ;;  %vm4530_vm2 = vmor %vm1469_vm0, %vm1470_vm1  ;;  %s183_s28 = scalar_lea.vmem %s5468_s3, %s3789_s25 }
  0x18   : > { %2153 = vmatpush1.bf16.msra.mxu0 %v3948_v19  ;;  %755 = vmatprep.subr.bf16.mxu1 %v3949_v20  ;;  %v3991_v52 = vld [vmem:[%s5466_s1 + $0x4c4] ss:$8 sps:$4 sm:$0xff]   ;;  %v3426_v54 = vcombine.high %v4498_v48, %v4501_v49  ;;  %v1439_v56 = vld [vmem:[%s4483_s30 + $0x10] sm:$0x11]  ;;  %v3995_v60 = vld [vmem:[%s5466_s1 + $0x4c0] ss:$8 sps:$4 sm:$0xff]  }
  0x19   : > { %2154 = vmatprep.subr.bf16.mxu0 %v3951_v21  ;;  %v3993_v53 = vld [vmem:[%s5466_s1 + $0x2c4] ss:$8 sps:$4 sm:$0xff]   ;;  %v1443_v57 = vld [vmem:[%s4483_s30 + $0x30] sm:$0x11]  ;;  %v1482_v61 = vshll.u32 %v1439_v56, 16  ;;  %v1503_v62 = vrot.slane %v1501_v50, 4 }
  0x1a   : > { %v1437_v55 = vld [vmem:[%s4483_s30] sm:$0xff]  ;;  %777 = vmatprep.mubr.bf16.mxu1 %v3426_v54  ;;  %v1506_v63 = vrot.slane %v1504_v51, 5  ;;  %v1510_v0 = vshll.u32 %v1443_v57, 16  ;;  %v3999_v5 = vld [vmem:[%s5466_s1 + $0x2d4] ss:$8 sps:$4 sm:$0xff]  }
  0x1b   : > { %756 = vmatpush1.bf16.msra.mxu1 %v3953_v22  ;;  %v1473_v58 = vshrl.u32 %v1437_v55, 16  ;;  %v1476_v59 = vshll.u32 %v1437_v55, 16  ;;  %v3996_v1 = vld [vmem:[%s5466_s1 + $0x2c0] ss:$8 sps:$4 sm:$0xff]   ;;  %v1484_v10 = vrot.slane %v1482_v61, 5 }
  0x1c   : > { %2155 = vmatpush1.bf16.msra.mxu0 %v3954_v23  ;;  %757 = vmatprep.subr.bf16.mxu1 %v3955_v24  ;;  %v1507_v6 = vor.u32 %v1506_v63, %v1503_v62  ;;  %v1512_v7 = vrot.slane %v1510_v0, 5  ;;  %v4001_v12 = vld [vmem:[%s5466_s1 + $0x4d0] ss:$8 sps:$4 sm:$0xff]   ;;  %v4003_v15 = vld [vmem:[%s5466_s1 + $0x4e4] ss:$8 sps:$4 sm:$0xff]  }
  0x1d   : > { %2156 = vmatprep.subr.bf16.mxu0 %v3957_v25  ;;  %v1475_v3 = vrot.slane %v1473_v58, 4  ;;  %v1478_v4 = vrot.slane %v1476_v59, 5  ;;  %v4002_v13 = vld [vmem:[%s5466_s1 + $0x2d0] ss:$8 sps:$4 sm:$0xff]   ;;  %v4005_v17 = vld [vmem:[%s5466_s1 + $0x2e4] ss:$8 sps:$4 sm:$0xff]  }
  0x1e   : > { %v1508_v11 = vrot.slane %v1507_v6, 4  ;;  %v4007_v20 = vld [vmem:[%s5466_s1 + $0x4e0] ss:$8 sps:$4 sm:$0xff]   ;;  %v4009_v22 = vld [vmem:[%s5466_s1 + $0x4f4] ss:$8 sps:$4 sm:$0xff]  }
  0x1f   : > { %758 = vmatpush1.bf16.msra.mxu1 %v3959_v26  ;;  %v1479_v9 = vor.u32 %v1478_v4, %v1475_v3  ;;  %v4008_v21 = vld [vmem:[%s5466_s1 + $0x2e0] ss:$8 sps:$4 sm:$0xff]   ;;  %v4011_v23 = vld [vmem:[%s5466_s1 + $0x2f4] ss:$8 sps:$4 sm:$0xff]   ;;  %v4013_v24 = vld [vmem:[%s5466_s1 + $0x4f0] ss:$8 sps:$4 sm:$0xff]  }
  0x20   : > { %2157 = vmatpush1.bf16.msra.mxu0 %v3960_v27  ;;  %759 = vmatprep.subr.bf16.mxu1 %v3961_v28  ;;  %v1513_v16 = vsel %vm4530_vm2, %v1508_v11, %v1512_v7  ;;  %v4014_v25 = vld [vmem:[%s5466_s1 + $0x2f0] ss:$8 sps:$4 sm:$0xff]   ;;  %v4017_v26 = vld [vmem:[%s5466_s1 + $0x504] ss:$8 sps:$4 sm:$0xff]   ;;  %v3425_v28 = vcombine.low %v4498_v48, %v4501_v49  ;;  %v4038_v48 = vld [vmem:[%s5466_s1 + $0x334] ss:$8 sps:$4 sm:$0xff]  }
  0x21   : > { %2158 = vmatprep.subr.bf16.mxu0 %v3963_v29  ;;  %v1480_v14 = vrot.slane %v1479_v9, 4  ;;  %v4020_v27 = vld [vmem:[%s5466_s1 + $0x304] ss:$8 sps:$4 sm:$0xff]   ;;  %v4015_v29 = vld [vmem:[%s5466_s1 + $0x500] ss:$8 sps:$4 sm:$0xff]  }
  0x22   : > { %v4033_v51 = vld [vmem:[%s5466_s1 + $0x530] ss:$8 sps:$4 sm:$0xff]   ;;  %v4041_v63 = vld [vmem:[%s5466_s1 + $0x544] ss:$8 sps:$4 sm:$0xff]   ;;  %v4042_v7 = vld [vmem:[%s5466_s1 + $0x340] ss:$8 sps:$4 sm:$0xff]  }
  0x23   : > { %760 = vmatpush1.bf16.msra.mxu1 %v3965_v30  ;;  %v1485_v18 = vsel %vm4530_vm2, %v1480_v14, %v1484_v10  ;;  %v4036_v56 = vld [vmem:[%s5466_s1 + $0x330] ss:$8 sps:$4 sm:$0xff]   ;;  %v4044_v0 = vld [vmem:[%s5466_s1 + $0x344] ss:$8 sps:$4 sm:$0xff]   ;;  %v4047_v11 = vld [vmem:[%s5466_s1 + $0x554] ss:$8 sps:$4 sm:$0xff]  }
  0x24   : > { %2159 = vmatpush1.bf16.msra.mxu0 %v3966_v31  ;;  %761 = vmatprep.subr.bf16.mxu1 %v3967_v32  ;;  %v3586_v19 = vcombine.high %v1485_v18, %v1513_v16  ;;  %v3585_v30 = vcombine.low %v1485_v18, %v1513_v16  ;;  %v4018_v31 = vld [vmem:[%s5466_s1 + $0x300] ss:$8 sps:$4 sm:$0xff]   ;;  %v4023_v32 = vld [vmem:[%s5466_s1 + $0x514] ss:$8 sps:$4 sm:$0xff]  }
  0x25   : > { %2160 = vmatprep.subr.bf16.mxu0 %v3969_v33  ;;  %v1529_v33 = vshrl.u32 %v4501_v49, 16  ;;  %v3417_v9 = vld [vmem:[%s4483_s30 + $0xa0] sm:$0xff]  ;;  %v4050_v16 = vld [vmem:[%s5466_s1 + $0x354] ss:$8 sps:$4 sm:$0xff]  }
  0x26   : > { %2176 = vmatprep.mubr.bf16.mxu0 %v3586_v19  ;;  %v3419_v10 = vld [vmem:[%s4483_s30 + $0xc0] sm:$0xff]  ;;  %v1459_v18 = vld [vmem:[%s4483_s30 + $0xb0] sm:$0x11] }
  0x27   : > { %762 = vmatpush1.bf16.msra.mxu1 %v3971_v34  ;;  %v1532_v34 = vshll.u32 %v4501_v49, 16  ;;  %v3434_v14 = vcombine.high %v3417_v9, %v3419_v10  ;;  %v3433_v19 = vcombine.low %v3417_v9, %v3419_v10 }
  0x28   : > { %2161 = vmatpush1.bf16.msra.mxu0 %v3972_v35  ;;  %763 = vmatprep.subr.bf16.mxu1 %v3973_v36  ;;  %v4026_v35 = vld [vmem:[%s5466_s1 + $0x314] ss:$8 sps:$4 sm:$0xff]   ;;  %v4021_v36 = vld [vmem:[%s5466_s1 + $0x510] ss:$8 sps:$4 sm:$0xff]  }
  0x29   : > { %2162 = vmatprep.subr.bf16.mxu0 %v3975_v37  ;;  %v4024_v37 = vld [vmem:[%s5466_s1 + $0x310] ss:$8 sps:$4 sm:$0xff]  }
  0x2b   : > { %764 = vmatpush1.bf16.msra.mxu1 %v3977_v38  ;;  %v4029_v38 = vld [vmem:[%s5466_s1 + $0x524] ss:$8 sps:$4 sm:$0xff]  }
  0x2c   : > { %2163 = vmatpush1.bf16.msra.mxu0 %v3978_v39  ;;  %765 = vmatprep.subr.bf16.mxu1 %v3979_v40  ;;  %v1531_v39 = vrot.slane %v1529_v33, 4  ;;  %v1534_v40 = vrot.slane %v1532_v34, 5  ;;  %v4056_v34 = vld [vmem:[%s5466_s1 + $0x364] ss:$8 sps:$4 sm:$0xff]  }
  0x2d   : > { %2164 = vmatprep.subr.bf16.mxu0 %v3981_v41  ;;  %v4032_v41 = vld [vmem:[%s5466_s1 + $0x324] ss:$8 sps:$4 sm:$0xff]  }
  0x2f   : > { %766 = vmatpush1.bf16.msra.mxu1 %v3983_v42  ;;  %v4027_v42 = vld [vmem:[%s5466_s1 + $0x520] ss:$8 sps:$4 sm:$0xff]  }
  0x30   : > { %2165 = vmatpush1.bf16.msra.mxu0 %v3984_v43  ;;  %767 = vmatprep.subr.bf16.mxu1 %v3985_v44  ;;  %v4030_v43 = vld [vmem:[%s5466_s1 + $0x320] ss:$8 sps:$4 sm:$0xff]  }
  0x31   : > { %2166 = vmatprep.subr.bf16.mxu0 %v3987_v45  ;;  %v3413_v44 = vld [vmem:[%s4483_s30 + $0x60] sm:$0xff] }
  0x32   : > { %v3415_v45 = vld [vmem:[%s4483_s30 + $0x80] sm:$0xff]  ;;  %v1557_v50 = vshrl.u32 %v3413_v44, 16  ;;  %v1560_v54 = vshll.u32 %v3413_v44, 16 }
  0x33   : > { %768 = vmatpush1.bf16.msra.mxu1 %v3989_v46  ;;  %v1535_v46 = vor.u32 %v1534_v40, %v1531_v39  ;;  %v3430_v49 = vcombine.high %v3413_v44, %v3415_v45  ;;  %v3429_v55 = vcombine.low %v3413_v44, %v3415_v45  ;;  %v1585_v62 = vshrl.u32 %v3415_v45, 16  ;;  %v3423_v40 = vld [vmem:[%s4483_s30 + $0x100] sm:$0xff] }
  0x34   : > { %2167 = vmatpush1.bf16.msra.mxu0 %v3990_v47  ;;  %769 = vmatprep.subr.bf16.mxu1 %v3991_v52  ;;  %v4035_v47 = vld [vmem:[%s5466_s1 + $0x534] ss:$8 sps:$4 sm:$0xff]   ;;  %v1559_v58 = vrot.slane %v1557_v50, 4  ;;  %v1562_v61 = vrot.slane %v1560_v54, 5  ;;  %v1588_v6 = vshll.u32 %v3415_v45, 16  ;;  %v1644_v45 = vshll.u32 %v3419_v10, 16 }
  0x35   : > { %2168 = vmatprep.subr.bf16.mxu0 %v3993_v53  ;;  %v1447_v52 = vld [vmem:[%s4483_s30 + $0x50] sm:$0x11] }
  0x36   : > { %v1451_v53 = vld [vmem:[%s4483_s30 + $0x70] sm:$0x11]  ;;  %v1538_v57 = vshll.u32 %v1447_v52, 16  ;;  %v1563_v3 = vor.u32 %v1562_v61, %v1559_v58 }
  0x37   : > { %770 = vmatpush1.bf16.msra.mxu1 %v3995_v60  ;;  %v1566_v59 = vshll.u32 %v1451_v53, 16  ;;  %v1536_v60 = vrot.slane %v1535_v46, 4  ;;  %v1467_v50 = vld [vmem:[%s4483_s30 + $0xf0] sm:$0x11]  ;;  %v1646_v53 = vrot.slane %v1644_v45, 5 }
  0x38   : > { %2169 = vmatpush1.bf16.msra.mxu0 %v3996_v1  ;;  %771 = vmatprep.subr.bf16.mxu1 %v3997_v2  ;;  %v1540_v1 = vrot.slane %v1538_v57, 5  ;;  %v4039_v2 = vld [vmem:[%s5466_s1 + $0x540] ss:$8 sps:$4 sm:$0xff]   ;;  %v1678_v57 = vshll.u32 %v1467_v50, 16 }
  0x39   : > { %2170 = vmatprep.subr.bf16.mxu0 %v3999_v5  ;;  %v1568_v4 = vrot.slane %v1566_v59, 5  ;;  %v1587_v5 = vrot.slane %v1585_v62, 4  ;;  %v4057_v59 = vld [vmem:[%s5466_s1 + $0x570] ss:$8 sps:$4 sm:$0xff]   ;;  %v4078_v45 = vld [vmem:[%s5466_s1 + $0x3a0] ss:$8 sps:$4 sm:$0xff]  }
  0x3a   : > { %v4060_v62 = vld [vmem:[%s5466_s1 + $0x370] ss:$8 sps:$4 sm:$0xff]  }
  0x3b   : > { %772 = vmatpush1.bf16.msra.mxu1 %v4001_v12  ;;  %v1541_v12 = vsel %vm4530_vm2, %v1536_v60, %v1540_v1 }
  0x3c   : > { %2171 = vmatpush1.bf16.msra.mxu0 %v4002_v13  ;;  %773 = vmatprep.subr.bf16.mxu1 %v4003_v15  ;;  %v1564_v13 = vrot.slane %v1563_v3, 4  ;;  %v1590_v15 = vrot.slane %v1588_v6, 5  ;;  %v4065_v3 = vld [vmem:[%s5466_s1 + $0x584] ss:$8 sps:$4 sm:$0xff]  }
  0x3d   : > { %2172 = vmatprep.subr.bf16.mxu0 %v4005_v17  ;;  %v1455_v17 = vld [vmem:[%s4483_s30 + $0x90] sm:$0x11]  ;;  %v4695_v6 = vld [vmem:[%s4483_s30 + $0x28] sm:$0xff] }
  0x3f   : > { %774 = vmatpush1.bf16.msra.mxu1 %v4007_v20  ;;  %v4045_v20 = vld [vmem:[%s5466_s1 + $0x550] ss:$8 sps:$4 sm:$0xff]  }
  0x40   : > { %2173 = vmatpush1.bf16.msra.mxu0 %v4008_v21  ;;  %775 = vmatprep.subr.bf16.mxu1 %v4009_v22  ;;  %v1569_v21 = vsel %vm4530_vm2, %v1564_v13, %v1568_v4  ;;  %v1591_v22 = vor.u32 %v1590_v15, %v1587_v5  ;;  %v4068_v4 = vld [vmem:[%s5466_s1 + $0x384] ss:$8 sps:$4 sm:$0xff]   ;;  %v1515_v13 = vshrl.u32 %v4695_v6, 16  ;;  %v4071_v15 = vld [vmem:[%s5466_s1 + $0x594] ss:$8 sps:$4 sm:$0xff]  }
  0x41   : > { %2174 = vmatprep.subr.bf16.mxu0 %v4011_v23  ;;  %v1594_v23 = vshll.u32 %v1455_v17, 16 }
  0x43   : > { %776 = vmatpush1.bf16.msra.mxu1 %v4013_v24  ;;  %v1613_v24 = vshrl.u32 %v3417_v9, 16 }
  0x44   : > { %2175 = vmatpush1.bf16.msra.mxu0 %v4014_v25  ;;  %818 = vmatprep.subr.bf16.mxu1 %v4017_v26  ;;  %v4048_v25 = vld [vmem:[%s5466_s1 + $0x350] ss:$8 sps:$4 sm:$0xff]   ;;  %v3590_v26 = vcombine.high %v1541_v12, %v1569_v21 }
  0x45   : > { %2217 = vmatprep.subr.bf16.mxu0 %v4020_v27  ;;  %v3589_v27 = vcombine.low %v1541_v12, %v1569_v21  ;;  %v1615_v33 = vrot.slane %v1613_v24, 4  ;;  %v4704_v12 = vld [vmem:[%s4483_s30 + $0x48] sm:$0xff]  ;;  %v1440_v21 = vld [vmem:[%s4483_s30 + $0x18] sm:$0x11] }
  0x46   : > { %778 = vmatmul.mubr.bf16.vlgmr.msra.gmra.mrb[0].mxu1 %v3425_v28  ;;  %v1616_v28 = vshll.u32 %v3417_v9, 16  ;;  %v4066_v9 = vld [vmem:[%s5466_s1 + $0x380] ss:$8 sps:$4 sm:$0xff]   ;;  %v3428_v17 = vcombine.high %v4695_v6, %v4704_v12 }
  0x47   : > { %2177 = vmatmul.mubr.bf16.vlgmr.msra.gmra.mrb[0].mxu0 %v3585_v30  ;;  %819 = vmatpush1.bf16.msra.mxu1 %v4015_v29  ;;  %v1622_v29 = vshll.u32 %v1459_v18, 16  ;;  %v4053_v30 = vld [vmem:[%s5466_s1 + $0x564] ss:$8 sps:$4 sm:$0xff]  }
  0x48   : > { %2218 = vmatpush1.bf16.msra.mxu0 %v4018_v31  ;;  %820 = vmatprep.subr.bf16.mxu1 %v4023_v32  ;;  %v1592_v31 = vrot.slane %v1591_v22, 4  ;;  %v1596_v32 = vrot.slane %v1594_v23, 5  ;;  %v1438_v18 = vld [vmem:[%s4483_s30 + $0x8] sm:$0xff]  ;;  %v1444_v22 = vld [vmem:[%s4483_s30 + $0x38] sm:$0x11] }
  0x49   : > { %2219 = vmatprep.subr.bf16.mxu0 %v4026_v35  ;;  %787 = vmatprep.mubr.bf16.mxu1 %v3430_v49  ;;  %v1618_v35 = vrot.slane %v1616_v28, 5  ;;  %v1624_v39 = vrot.slane %v1622_v29, 5  ;;  %v1463_v49 = vld [vmem:[%s4483_s30 + $0xd0] sm:$0x11]  ;;  %v1487_v23 = vshrl.u32 %v1438_v18, 16  ;;  %v1490_v24 = vshll.u32 %v1438_v18, 16 }
  0x4a   : > { %2186 = vmatprep.mubr.bf16.mxu0 %v3590_v26  ;;  %v1650_v54 = vshll.u32 %v1463_v49, 16  ;;  %v1517_v26 = vrot.slane %v1515_v13, 4  ;;  %v4817_v13 = vld [vmem:[%s4483_s30 + $0x68] sm:$0xff]  ;;  %v1448_v18 = vld [vmem:[%s4483_s30 + $0x58] sm:$0x11] }
  0x4b   : > { %821 = vmatpush1.bf16.msra.mxu1 %v4021_v36  ;;  %v3421_v36 = vld [vmem:[%s4483_s30 + $0xe0] sm:$0xff]  ;;  %v1489_v29 = vrot.slane %v1487_v23, 4 }
  0x4c   : > { %2220 = vmatpush1.bf16.msra.mxu0 %v4024_v37  ;;  %822 = vmatprep.subr.bf16.mxu1 %v4029_v38  ;;  %v4051_v37 = vld [vmem:[%s5466_s1 + $0x560] ss:$8 sps:$4 sm:$0xff]   ;;  %v3438_v44 = vcombine.high %v3421_v36, %v3423_v40  ;;  %v1669_v46 = vshrl.u32 %v3421_v36, 16  ;;  %v3437_v58 = vcombine.low %v3421_v36, %v3423_v40  ;;  %v1652_v1 = vrot.slane %v1650_v54, 5  ;;  %v4092_v54 = vld [vmem:[%s5466_s1 + $0x3c4] ss:$8 sps:$4 sm:$0xff]  }
  0x4d   : > { %2221 = vmatprep.subr.bf16.mxu0 %v4032_v41  ;;  %v4054_v38 = vld [vmem:[%s5466_s1 + $0x360] ss:$8 sps:$4 sm:$0xff]   ;;  %v1641_v41 = vshrl.u32 %v3419_v10, 16 }
  0x4e   : > { %788 = vmatmul.mubr.bf16.gmra.mrb[4].mxu1 %v3429_v55  ;;  %v1671_v55 = vrot.slane %v1669_v46, 4  ;;  %v4114_v23 = vld [vmem:[%s5466_s1 + $0x600] ss:$8 sps:$4 sm:$0xff]  }
  0x4f   : > { %823 = vmatpush1.bf16.msra.mxu1 %v4027_v42  ;;  %797 = vmatprep.mubr.bf16.mxu1 %v3434_v14  ;;  %v4059_v42 = vld [vmem:[%s5466_s1 + $0x574] ss:$8 sps:$4 sm:$0xff]   ;;  %v1643_v52 = vrot.slane %v1641_v41, 4  ;;  %v1518_v14 = vshll.u32 %v4695_v6, 16 }
  0x50   : > { %2222 = vmatpush1.bf16.msra.mxu0 %v4030_v43  ;;  %824 = vmatprep.subr.bf16.mxu1 %v4035_v47  ;;  %v1619_v43 = vor.u32 %v1618_v35, %v1615_v33  ;;  %v4062_v47 = vld [vmem:[%s5466_s1 + $0x374] ss:$8 sps:$4 sm:$0xff]   ;;  %v4072_v35 = vld [vmem:[%s5466_s1 + $0x390] ss:$8 sps:$4 sm:$0xff]  }
  0x51   : > { %2223 = vmatprep.subr.bf16.mxu0 %v4038_v48  ;;  %2187 = vmatmul.mubr.bf16.gmra.mrb[4].mxu0 %v3589_v27  ;;  %v1597_v48 = vsel %vm4530_vm2, %v1592_v31, %v1596_v32  ;;  %v1647_v61 = vor.u32 %v1646_v53, %v1643_v52  ;;  %v1520_v27 = vrot.slane %v1518_v14, 5  ;;  %v4069_v31 = vld [vmem:[%s5466_s1 + $0x590] ss:$8 sps:$4 sm:$0xff]   ;;  %v4089_v53 = vld [vmem:[%s5466_s1 + $0x5c4] ss:$8 sps:$4 sm:$0xff]  }
  0x52   : > { %v4084_v52 = vld [vmem:[%s5466_s1 + $0x3b0] ss:$8 sps:$4 sm:$0xff]  }
  0x53   : > { %825 = vmatpush1.bf16.msra.mxu1 %v4033_v51  ;;  %v1620_v51 = vrot.slane %v1619_v43, 4  ;;  %v1648_v5 = vrot.slane %v1647_v61, 4  ;;  %v4075_v43 = vld [vmem:[%s5466_s1 + $0x5a0] ss:$8 sps:$4 sm:$0xff]   ;;  %v1546_v61 = vshll.u32 %v4704_v12, 16 }
  0x54   : > { %2224 = vmatpush1.bf16.msra.mxu0 %v4036_v56  ;;  %826 = vmatprep.subr.bf16.mxu1 %v4041_v63  ;;  %v1672_v56 = vshll.u32 %v3421_v36, 16  ;;  %v1521_v36 = vor.u32 %v1520_v27, %v1517_v26 }
  0x55   : > { %2225 = vmatprep.subr.bf16.mxu0 %v4044_v0  ;;  %v1625_v60 = vsel %vm4530_vm2, %v1620_v51, %v1624_v39  ;;  %v4080_v39 = vld [vmem:[%s5466_s1 + $0x3a4] ss:$8 sps:$4 sm:$0xff]   ;;  %v4081_v51 = vld [vmem:[%s5466_s1 + $0x5b0] ss:$8 sps:$4 sm:$0xff]  }
  0x56   : > { %798 = vmatmul.mubr.bf16.gmra.mrb[8].mxu1 %v3433_v19  ;;  %v3594_v63 = vcombine.high %v1597_v48, %v1625_v60  ;;  %v3593_v0 = vcombine.low %v1597_v48, %v1625_v60  ;;  %v1653_v19 = vsel %vm4530_vm2, %v1648_v5, %v1652_v1  ;;  %v4086_v48 = vld [vmem:[%s5466_s1 + $0x3b4] ss:$8 sps:$4 sm:$0xff]   ;;  %v1543_v60 = vshrl.u32 %v4704_v12, 16  ;;  %v4099_v1 = vld [vmem:[%s5466_s1 + $0x5e0] ss:$8 sps:$4 sm:$0xff]  }
  0x57   : > { %827 = vmatpush1.bf16.msra.mxu1 %v4039_v2  ;;  %807 = vmatprep.mubr.bf16.mxu1 %v3438_v44  ;;  %v1674_v2 = vrot.slane %v1672_v56, 5  ;;  %v4090_v56 = vld [vmem:[%s5466_s1 + $0x3c0] ss:$8 sps:$4 sm:$0xff]   ;;  %v4107_v5 = vld [vmem:[%s5466_s1 + $0x5f4] ss:$8 sps:$4 sm:$0xff]  }
  0x58   : > { %2226 = vmatpush1.bf16.msra.mxu0 %v4042_v7  ;;  %828 = vmatprep.subr.bf16.mxu1 %v4047_v11  ;;  %v4063_v7 = vld [vmem:[%s5466_s1 + $0x580] ss:$8 sps:$4 sm:$0xff]   ;;  %v1680_v11 = vrot.slane %v1678_v57, 5  ;;  %v4095_v57 = vld [vmem:[%s5466_s1 + $0x5d4] ss:$8 sps:$4 sm:$0xff]  }
  0x59   : > { %2227 = vmatprep.subr.bf16.mxu0 %v4050_v16  ;;  %2196 = vmatprep.mubr.bf16.mxu0 %v3594_v63  ;;  %v1675_v10 = vor.u32 %v1674_v2, %v1671_v55  ;;  %v4074_v16 = vld [vmem:[%s5466_s1 + $0x394] ss:$8 sps:$4 sm:$0xff]   ;;  %v4087_v55 = vld [vmem:[%s5466_s1 + $0x5c0] ss:$8 sps:$4 sm:$0xff]   ;;  %v4101_v63 = vld [vmem:[%s5466_s1 + $0x5e4] ss:$8 sps:$4 sm:$0xff]  }
  0x5a   : > { %2197 = vmatmul.mubr.bf16.gmra.mrb[8].mxu0 %v3593_v0  ;;  %v4104_v0 = vld [vmem:[%s5466_s1 + $0x3e4] ss:$8 sps:$4 sm:$0xff]   ;;  %v1545_v2 = vrot.slane %v1543_v60, 4 }
  0x5b   : > { %829 = vmatpush1.bf16.msra.mxu1 %v4045_v20  ;;  %v1676_v20 = vrot.slane %v1675_v10, 4  ;;  %v4108_v10 = vld [vmem:[%s5466_s1 + $0x3f0] ss:$8 sps:$4 sm:$0xff]  }
  0x5c   : > { %2228 = vmatpush1.bf16.msra.mxu0 %v4048_v25  ;;  %830 = vmatprep.subr.bf16.mxu1 %v4053_v30  ;;  %v1496_v25 = vshll.u32 %v1440_v21, 16  ;;  %v1524_v30 = vshll.u32 %v1444_v22, 16  ;;  %v3427_v21 = vcombine.low %v4695_v6, %v4704_v12  ;;  %v4111_v22 = vld [vmem:[%s5466_s1] ss:$8 sps:$4 sm:$0xff]   ;;  %v4119_v6 = vld [vmem:[%s5466_s1 + $0x14] ss:$8 sps:$4 sm:$0xff]  }
  0x5d   : > { %2229 = vmatprep.subr.bf16.mxu0 %v4056_v34  ;;  %v1681_v28 = vsel %vm4530_vm2, %v1676_v20, %v1680_v11  ;;  %v1492_v34 = vrot.slane %v1490_v24, 5  ;;  %v4113_v11 = vld [vmem:[%s5466_s1 + $0x4] ss:$8 sps:$4 sm:$0xff]   ;;  %v1574_v20 = vshll.u32 %v4817_v13, 16  ;;  %v1552_v24 = vshll.u32 %v1448_v18, 16 }
  0x5e   : > { %808 = vmatmul.mubr.bf16.gmra.mrb[12].mxu1 %v3437_v58  ;;  %v3598_v32 = vcombine.high %v1653_v19, %v1681_v28  ;;  %v3597_v33 = vcombine.low %v1653_v19, %v1681_v28  ;;  %v1498_v41 = vrot.slane %v1496_v25, 5  ;;  %v4098_v58 = vld [vmem:[%s5466_s1 + $0x3d4] ss:$8 sps:$4 sm:$0xff]  }
  0x5f   : > { %831 = vmatpush1.bf16.msra.mxu1 %v4051_v37  ;;  %850 = vmatprep.mubr.bf16.mxu1 %v3428_v17  ;;  %v1526_v37 = vrot.slane %v1524_v30, 5  ;;  %v1493_v40 = vor.u32 %v1492_v34, %v1489_v29  ;;  %v1571_v17 = vshrl.u32 %v4817_v13, 16  ;;  %v1452_v19 = vld [vmem:[%s4483_s30 + $0x78] sm:$0x11]  ;;  %v1576_v29 = vrot.slane %v1574_v20, 5 }
  0x60   : > { %2230 = vmatpush1.bf16.msra.mxu0 %v4054_v38  ;;  %832 = vmatprep.subr.bf16.mxu1 %v4059_v42  ;;  %v4077_v38 = vld [vmem:[%s5466_s1 + $0x5a4] ss:$8 sps:$4 sm:$0xff]   ;;  %v1522_v42 = vrot.slane %v1521_v36, 4  ;;  %v1580_v26 = vshll.u32 %v1452_v19, 16  ;;  %v4122_v12 = vld [vmem:[%s5466_s1 + $0x614] ss:$8 sps:$4 sm:$0xff]  }
  0x61   : > { %2231 = vmatprep.subr.bf16.mxu0 %v4062_v47  ;;  %2206 = vmatprep.mubr.bf16.mxu0 %v3598_v32  ;;  %v1494_v44 = vrot.slane %v1493_v40, 4  ;;  %v4083_v47 = vld [vmem:[%s5466_s1 + $0x5b4] ss:$8 sps:$4 sm:$0xff]   ;;  %v1573_v25 = vrot.slane %v1571_v17, 4  ;;  %v4117_v36 = vld [vmem:[%s5466_s1 + $0x10] ss:$8 sps:$4 sm:$0xff]  }
  0x62   : > { %2207 = vmatmul.mubr.bf16.gmra.mrb[12].mxu0 %v3597_v33  ;;  %v4743_v46 = vsel %vm4530_vm2, %v1522_v42, %v1526_v37  ;;  %v1582_v33 = vrot.slane %v1580_v26, 5  ;;  %v4138_v26 = vld [vmem:[%s5466_s1 + $0x640] ss:$8 sps:$4 sm:$0xff]  }
  0x63   : > { %833 = vmatpush1.bf16.msra.mxu1 %v4057_v59  ;;  %v4753_v49 = vsel %vm4530_vm2, %v1494_v44, %v1498_v41  ;;  %v4093_v59 = vld [vmem:[%s5466_s1 + $0x5d0] ss:$8 sps:$4 sm:$0xff]   ;;  %v1577_v32 = vor.u32 %v1576_v29, %v1573_v25  ;;  %v4135_v25 = vld [vmem:[%s5466_s1 + $0x40] ss:$8 sps:$4 sm:$0xff]  }
  0x64   : > { %2232 = vmatpush1.bf16.msra.mxu0 %v4060_v62  ;;  %834 = vmatprep.subr.bf16.mxu1 %v4065_v3  ;;  %v3588_v50 = vcombine.high %v4753_v49, %v4743_v46  ;;  %v4096_v62 = vld [vmem:[%s5466_s1 + $0x3d0] ss:$8 sps:$4 sm:$0xff]   ;;  %v1548_v3 = vrot.slane %v1546_v61, 5  ;;  %v3587_v27 = vcombine.low %v4753_v49, %v4743_v46  ;;  %v4128_v46 = vld [vmem:[%s5466_s1 + $0x624] ss:$8 sps:$4 sm:$0xff]  }
  0x65   : > { %2233 = vmatprep.subr.bf16.mxu0 %v4068_v4  ;;  %v4102_v4 = vld [vmem:[%s5466_s1 + $0x3e0] ss:$8 sps:$4 sm:$0xff]   ;;  %v1578_v41 = vrot.slane %v1577_v32, 4  ;;  %v1456_v44 = vld [vmem:[%s4483_s30 + $0x98] sm:$0x11] }
  0x66   : > { %2249 = vmatprep.mubr.bf16.mxu0 %v3588_v50  ;;  %v1549_v14 = vor.u32 %v1548_v3, %v1545_v2  ;;  %v1608_v49 = vshll.u32 %v1456_v44, 16  ;;  %v4126_v61 = vld [vmem:[%s5466_s1 + $0x620] ss:$8 sps:$4 sm:$0xff]  }
  0x67   : > { %835 = vmatpush1.bf16.msra.mxu1 %v4063_v7  ;;  %v4110_v7 = vld [vmem:[%s5466_s1 + $0x3f4] ss:$8 sps:$4 sm:$0xff]  }
  0x68   : > { %2234 = vmatpush1.bf16.msra.mxu0 %v4066_v9  ;;  %836 = vmatprep.subr.bf16.mxu1 %v4071_v15  ;;  %v4105_v9 = vld [vmem:[%s5466_s1 + $0x5f0] ss:$8 sps:$4 sm:$0xff]   ;;  %v4116_v15 = vld [vmem:[%s5466_s1 + $0x604] ss:$8 sps:$4 sm:$0xff]   ;;  %v1550_v28 = vrot.slane %v1549_v14, 4 }
  0x69   : > { %2235 = vmatprep.subr.bf16.mxu0 %v4074_v16  ;;  %v4823_v16 = vld [vmem:[%s4483_s30 + $0x88] sm:$0xff] }
  0x6a   : > { %v1599_v30 = vshrl.u32 %v4823_v16, 16  ;;  %v3432_v37 = vcombine.high %v4817_v13, %v4823_v16 }
  0x6b   : > { %837 = vmatpush1.bf16.msra.mxu1 %v4069_v31  ;;  %v1554_v31 = vrot.slane %v1552_v24, 5 }
  0x6c   : > { %2236 = vmatpush1.bf16.msra.mxu0 %v4072_v35  ;;  %838 = vmatprep.subr.bf16.mxu1 %v4077_v38  ;;  %v1601_v34 = vrot.slane %v1599_v30, 4  ;;  %v1602_v35 = vshll.u32 %v4823_v16, 16  ;;  %v4853_v38 = vld [vmem:[%s4483_s30 + $0xa8] sm:$0xff] }
  0x6d   : > { %2237 = vmatprep.subr.bf16.mxu0 %v4080_v39  ;;  %v4120_v39 = vld [vmem:[%s5466_s1 + $0x610] ss:$8 sps:$4 sm:$0xff]   ;;  %v1555_v40 = vsel %vm4530_vm2, %v1550_v28, %v1554_v31  ;;  %v1627_v50 = vshrl.u32 %v4853_v38, 16 }
  0x6e   : > { %v1604_v42 = vrot.slane %v1602_v35, 5 }
  0x6f   : > { %839 = vmatpush1.bf16.msra.mxu1 %v4075_v43  ;;  %v4125_v43 = vld [vmem:[%s5466_s1 + $0x24] ss:$8 sps:$4 sm:$0xff]   ;;  %v1629_v60 = vrot.slane %v1627_v50, 4 }
  0x70   : > { %2238 = vmatpush1.bf16.msra.mxu0 %v4078_v45  ;;  %840 = vmatprep.subr.bf16.mxu1 %v4083_v47  ;;  %v1460_v45 = vld [vmem:[%s4483_s30 + $0xb8] sm:$0x11]  ;;  %v1583_v47 = vsel %vm4530_vm2, %v1578_v41, %v1582_v33 }
  0x71   : > { %2239 = vmatprep.subr.bf16.mxu0 %v4086_v48  ;;  %v1605_v48 = vor.u32 %v1604_v42, %v1601_v34  ;;  %v4143_v33 = vld [vmem:[%s5466_s1 + $0x54] ss:$8 sps:$4 sm:$0xff]  }
  0x72   : > { %v4146_v34 = vld [vmem:[%s5466_s1 + $0x654] ss:$8 sps:$4 sm:$0xff]  }
  0x73   : > { %841 = vmatpush1.bf16.msra.mxu1 %v4081_v51  ;;  %v3592_v51 = vcombine.high %v1555_v40, %v1583_v47  ;;  %v3667_v42 = vld [vmem:[%s4483_s30 + $0x30] sm:$0x11] }
  0x74   : > { %2240 = vmatpush1.bf16.msra.mxu0 %v4084_v52  ;;  %842 = vmatprep.subr.bf16.mxu1 %v4089_v53  ;;  %v3431_v52 = vcombine.low %v4817_v13, %v4823_v16  ;;  %v4874_v53 = vld [vmem:[%s4483_s30 + $0xc8] sm:$0xff]  ;;  %v1468_v16 = vld [vmem:[%s4483_s30 + $0xf8] sm:$0x11]  ;;  %v2348_v50 = vshll.u32 %v3667_v42, 16  ;;  %v5071_v42 = vld [vmem:[%s4483_s30 + $0x80] sm:$0xff] }
  0x75   : > { %2241 = vmatprep.subr.bf16.mxu0 %v4092_v54  ;;  %v1630_v54 = vshll.u32 %v4853_v38, 16  ;;  %v3436_v2 = vcombine.high %v4853_v38, %v4874_v53  ;;  %v1655_v3 = vshrl.u32 %v4874_v53, 16  ;;  %v4137_v13 = vld [vmem:[%s5466_s1 + $0x44] ss:$8 sps:$4 sm:$0xff]   ;;  %v1692_v24 = vshll.u32 %v1468_v16, 16 }
  0x76   : > { %v3435_v28 = vcombine.low %v4853_v38, %v4874_v53  ;;  %v4939_v38 = vld [vmem:[%s4483_s30 + $0x20] sm:$0xff]  ;;  %v4156_v16 = vld [vmem:[%s5466_s1 + $0x670] ss:$8 sps:$4 sm:$0xff]  }
  0x77   : > { %843 = vmatpush1.bf16.msra.mxu1 %v4087_v55  ;;  %v1636_v55 = vshll.u32 %v1460_v45, 16  ;;  %v1657_v18 = vrot.slane %v1655_v3, 4 }
  0x78   : > { %2242 = vmatpush1.bf16.msra.mxu0 %v4090_v56  ;;  %844 = vmatprep.subr.bf16.mxu1 %v4095_v57  ;;  %v4123_v56 = vld [vmem:[%s5466_s1 + $0x20] ss:$8 sps:$4 sm:$0xff]   ;;  %v3591_v57 = vcombine.low %v1555_v40, %v1583_v47  ;;  %v4144_v40 = vld [vmem:[%s5466_s1 + $0x650] ss:$8 sps:$4 sm:$0xff]  }
  0x79   : > { %2243 = vmatprep.subr.bf16.mxu0 %v4098_v58  ;;  %v1606_v58 = vrot.slane %v1605_v48, 4  ;;  %v3671_v47 = vld [vmem:[%s4483_s30 + $0x50] sm:$0x11]  ;;  %v2339_v48 = vshrl.u32 %v4939_v38, 16 }
  0x7b   : > { %845 = vmatpush1.bf16.msra.mxu1 %v4093_v59  ;;  %v1610_v59 = vrot.slane %v1608_v49, 5  ;;  %v2342_v49 = vshll.u32 %v4939_v38, 16 }
  0x7c   : > { %2244 = vmatpush1.bf16.msra.mxu0 %v4096_v62  ;;  %846 = vmatprep.subr.bf16.mxu1 %v4101_v63  ;;  %v1632_v62 = vrot.slane %v1630_v54, 5  ;;  %v4884_v63 = vld [vmem:[%s4483_s30 + $0xe8] sm:$0xff] }
  0x7d   : > { %2245 = vmatprep.subr.bf16.mxu0 %v4104_v0  ;;  %v4131_v0 = vld [vmem:[%s5466_s1 + $0x34] ss:$8 sps:$4 sm:$0xff]   ;;  %v1611_v14 = vsel %vm4530_vm2, %v1606_v58, %v1610_v59  ;;  %v4147_v58 = vld [vmem:[%s5466_s1 + $0x60] ss:$8 sps:$4 sm:$0xff]  }
  0x7f   : > { %847 = vmatpush1.bf16.msra.mxu1 %v4099_v1  ;;  %v4134_v1 = vld [vmem:[%s5466_s1 + $0x634] ss:$8 sps:$4 sm:$0xff]  }
  0x80   : > { %2246 = vmatpush1.bf16.msra.mxu0 %v4102_v4  ;;  %848 = vmatprep.subr.bf16.mxu1 %v4107_v5  ;;  %v4129_v4 = vld [vmem:[%s5466_s1 + $0x30] ss:$8 sps:$4 sm:$0xff]  }
  0x81   : > { %2247 = vmatprep.subr.bf16.mxu0 %v4110_v7  ;;  %v4132_v5 = vld [vmem:[%s5466_s1 + $0x630] ss:$8 sps:$4 sm:$0xff]   ;;  %v1633_v7 = vor.u32 %v1632_v62, %v1629_v60 }
  0x83   : > { %849 = vmatpush1.bf16.msra.mxu1 %v4105_v9  ;;  %v1638_v9 = vrot.slane %v1636_v55, 5  ;;  %v4910_v17 = vrot.slane %v1633_v7, 4  ;;  %v2341_v55 = vrot.slane %v2339_v48, 4 }
  0x84   : > { %2248 = vmatpush1.bf16.msra.mxu0 %v4108_v10  ;;  %1291 = vmatprep.subr.bf16.mxu1 %v4113_v11  ;;  %v1658_v10 = vshll.u32 %v4874_v53, 16  ;;  %v1683_v11 = vshrl.u32 %v4884_v63, 16  ;;  %v4152_v53 = vld [vmem:[%s5466_s1 + $0x664] ss:$8 sps:$4 sm:$0xff]  }
  0x85   : > { %3010 = vmatprep.subr.bf16.mxu0 %v4116_v15  ;;  %v1464_v15 = vld [vmem:[%s4483_s30 + $0xd8] sm:$0x11] }
  0x86   : > { %851 = vmatmul.mubr.bf16.vlgmr.msra.gmra.mrb[0].mxu1 %v3427_v21  ;;  %v1660_v19 = vrot.slane %v1658_v10, 5  ;;  %v1664_v20 = vshll.u32 %v1464_v15, 16  ;;  %v4140_v21 = vld [vmem:[%s5466_s1 + $0x644] ss:$8 sps:$4 sm:$0xff]   ;;  %v4153_v15 = vld [vmem:[%s5466_s1 + $0x70] ss:$8 sps:$4 sm:$0xff]  }
  0x87   : > { %2250 = vmatmul.mubr.bf16.vlgmr.msra.gmra.mrb[0].mxu0 %v3587_v27  ;;  %1292 = vmatpush1.bf16.msra.mxu1 %v4111_v22  ;;  %v1685_v22 = vrot.slane %v1683_v11, 4  ;;  %v1639_v27 = vsel %vm4530_vm2, %v4910_v17, %v1638_v9 }
  0x88   : > { %3011 = vmatpush1.bf16.msra.mxu0 %v4114_v23  ;;  %1293 = vmatprep.subr.bf16.mxu1 %v4119_v6  ;;  %v1686_v23 = vshll.u32 %v4884_v63, 16  ;;  %v1661_v29 = vor.u32 %v1660_v19, %v1657_v18  ;;  %v3596_v30 = vcombine.high %v1611_v14, %v1639_v27  ;;  %v3595_v6 = vcombine.low %v1611_v14, %v1639_v27  ;;  %v4161_v18 = vld [vmem:[%s5466_s1 + $0x84] ss:$8 sps:$4 sm:$0xff]   ;;  %v4168_v27 = vld [vmem:[%s5466_s1 + $0x690] ss:$8 sps:$4 sm:$0xff]  }
  0x89   : > { %3012 = vmatprep.subr.bf16.mxu0 %v4122_v12  ;;  %860 = vmatprep.mubr.bf16.mxu1 %v3432_v37  ;;  %v4928_v12 = vld [vmem:[%s4483_s30 + $0x108] sm:$0xff]  ;;  %v1666_v31 = vrot.slane %v1664_v20, 5  ;;  %v1694_v37 = vrot.slane %v1692_v24, 5  ;;  %v4167_v24 = vld [vmem:[%s5466_s1 + $0x94] ss:$8 sps:$4 sm:$0xff]  }
  0x8a   : > { %2259 = vmatprep.mubr.bf16.mxu0 %v3592_v51  ;;  %v1688_v32 = vrot.slane %v1686_v23, 5  ;;  %v4936_v35 = vrot.slane %v1661_v29, 4  ;;  %v3440_v41 = vcombine.high %v4884_v63, %v4928_v12  ;;  %v3439_v60 = vcombine.low %v4884_v63, %v4928_v12  ;;  %v4158_v63 = vld [vmem:[%s5466_s1 + $0x674] ss:$8 sps:$4 sm:$0xff]   ;;  %v4164_v19 = vld [vmem:[%s5466_s1 + $0x684] ss:$8 sps:$4 sm:$0xff]  }
  0x8b   : > { %1294 = vmatpush1.bf16.msra.mxu1 %v4117_v36  ;;  %v4162_v23 = vld [vmem:[%s5466_s1 + $0x680] ss:$8 sps:$4 sm:$0xff]   ;;  %v4176_v29 = vld [vmem:[%s5466_s1 + $0x6a4] ss:$8 sps:$4 sm:$0xff]  }
  0x8c   : > { %3013 = vmatpush1.bf16.msra.mxu0 %v4120_v39  ;;  %1295 = vmatprep.subr.bf16.mxu1 %v4125_v43  ;;  %v1689_v36 = vor.u32 %v1688_v32, %v1685_v22  ;;  %v4141_v39 = vld [vmem:[%s5466_s1 + $0x50] ss:$8 sps:$4 sm:$0xff]   ;;  %v4149_v43 = vld [vmem:[%s5466_s1 + $0x64] ss:$8 sps:$4 sm:$0xff]   ;;  %v1667_v44 = vsel %vm4530_vm2, %v4936_v35, %v1666_v31  ;;  %v4159_v22 = vld [vmem:[%s5466_s1 + $0x80] ss:$8 sps:$4 sm:$0xff]  }
  0x8d   : > { %3014 = vmatprep.subr.bf16.mxu0 %v4128_v46  ;;  %v4959_v46 = vld [vmem:[%s4483_s30 + $0x40] sm:$0xff]  ;;  %v4179_v31 = vld [vmem:[%s5466_s1 + $0xb4] ss:$8 sps:$4 sm:$0xff]  }
  0x8e   : > { %861 = vmatmul.mubr.bf16.gmra.mrb[4].mxu1 %v3431_v52  ;;  %v4956_v45 = vrot.slane %v1689_v36, 4  ;;  %v2367_v51 = vshrl.u32 %v4959_v46, 16  ;;  %v2370_v52 = vshll.u32 %v4959_v46, 16  ;;  %v4182_v32 = vld [vmem:[%s5466_s1 + $0x6b4] ss:$8 sps:$4 sm:$0xff]  }
  0x8f   : > { %2260 = vmatmul.mubr.bf16.gmra.mrb[4].mxu0 %v3591_v57  ;;  %1296 = vmatpush1.bf16.msra.mxu1 %v4123_v56  ;;  %v2344_v56 = vrot.slane %v2342_v49, 5  ;;  %v2376_v57 = vshll.u32 %v3671_v47, 16  ;;  %v4185_v36 = vld [vmem:[%s5466_s1 + $0xc4] ss:$8 sps:$4 sm:$0xff]   ;;  %v3679_v49 = vld [vmem:[%s4483_s30 + $0x90] sm:$0x11] }
  0x90   : > { %3015 = vmatpush1.bf16.msra.mxu0 %v4126_v61  ;;  %1297 = vmatprep.subr.bf16.mxu1 %v4131_v0  ;;  %v1695_v54 = vsel %vm4530_vm2, %v4956_v45, %v1694_v37  ;;  %v2369_v61 = vrot.slane %v2367_v51, 4  ;;  %v4978_v0 = vld [vmem:[%s4483_s30] sm:$0xff]  ;;  %v2372_v3 = vrot.slane %v2370_v52, 5  ;;  %v2426_v51 = vshll.u32 %v5071_v42, 16  ;;  %v4194_v52 = vld [vmem:[%s5466_s1 + $0x6d4] ss:$8 sps:$4 sm:$0xff]  }
  0x91   : > { %3016 = vmatprep.subr.bf16.mxu0 %v4134_v1  ;;  %870 = vmatprep.mubr.bf16.mxu1 %v3436_v2  ;;  %v3600_v59 = vcombine.high %v1667_v44, %v1695_v54  ;;  %v3599_v62 = vcombine.low %v1667_v44, %v1695_v54  ;;  %v2345_v1 = vor.u32 %v2344_v56, %v2341_v55  ;;  %v2350_v2 = vrot.slane %v2348_v50, 5  ;;  %v4188_v37 = vld [vmem:[%s5466_s1 + $0x6c4] ss:$8 sps:$4 sm:$0xff]   ;;  %v3675_v44 = vld [vmem:[%s4483_s30 + $0x70] sm:$0x11] }
  0x92   : > { %2269 = vmatprep.mubr.bf16.mxu0 %v3596_v30  ;;  %v2373_v9 = vor.u32 %v2372_v3, %v2369_v61  ;;  %v2378_v10 = vrot.slane %v2376_v57, 5  ;;  %v3506_v11 = vcombine.high %v4978_v0, %v4939_v38  ;;  %v4171_v30 = vld [vmem:[%s5466_s1 + $0xa0] ss:$8 sps:$4 sm:$0xff]   ;;  %v2423_v50 = vshrl.u32 %v5071_v42, 16 }
  0x93   : > { %1298 = vmatpush1.bf16.msra.mxu1 %v4129_v4  ;;  %v4150_v4 = vld [vmem:[%s5466_s1 + $0x660] ss:$8 sps:$4 sm:$0xff]   ;;  %v2346_v7 = vrot.slane %v2345_v1, 4  ;;  %v2428_v56 = vrot.slane %v2426_v51, 5  ;;  %v2404_v57 = vshll.u32 %v3675_v44, 16 }
  0x94   : > { %3017 = vmatpush1.bf16.msra.mxu0 %v4132_v5  ;;  %1299 = vmatprep.subr.bf16.mxu1 %v4137_v13  ;;  %v4155_v5 = vld [vmem:[%s5466_s1 + $0x74] ss:$8 sps:$4 sm:$0xff]   ;;  %v2374_v14 = vrot.slane %v2373_v9, 4  ;;  %v2425_v55 = vrot.slane %v2423_v50, 4  ;;  %v4197_v1 = vld [vmem:[%s5466_s1 + $0xe4] ss:$8 sps:$4 sm:$0xff]  }
  0x95   : > { %3018 = vmatprep.subr.bf16.mxu0 %v4140_v21  ;;  %v4993_v13 = vsel %vm4530_vm2, %v2346_v7, %v2350_v2  ;;  %v4200_v2 = vld [vmem:[%s5466_s1 + $0x6e4] ss:$8 sps:$4 sm:$0xff]   ;;  %v4195_v3 = vld [vmem:[%s5466_s1 + $0xe0] ss:$8 sps:$4 sm:$0xff]   ;;  %v4203_v7 = vld [vmem:[%s5466_s1 + $0xf4] ss:$8 sps:$4 sm:$0xff]  }
  0x96   : > { %871 = vmatmul.mubr.bf16.gmra.mrb[8].mxu1 %v3435_v28  ;;  %v5009_v20 = vsel %vm4530_vm2, %v2374_v14, %v2378_v10  ;;  %v4173_v28 = vld [vmem:[%s5466_s1 + $0xa4] ss:$8 sps:$4 sm:$0xff]   ;;  %v2406_v9 = vrot.slane %v2404_v57, 5  ;;  %v4215_v51 = vld [vmem:[%s5466_s1 + $0x114] ss:$8 sps:$4 sm:$0xff]  }
  0x97   : > { %2270 = vmatmul.mubr.bf16.gmra.mrb[8].mxu0 %v3595_v6  ;;  %1300 = vmatpush1.bf16.msra.mxu1 %v4135_v25  ;;  %v3698_v21 = vcombine.high %v4993_v13, %v5009_v20  ;;  %v4170_v25 = vld [vmem:[%s5466_s1 + $0x694] ss:$8 sps:$4 sm:$0xff]   ;;  %v4174_v6 = vld [vmem:[%s5466_s1 + $0x6a0] ss:$8 sps:$4 sm:$0xff]   ;;  %v4213_v57 = vld [vmem:[%s5466_s1 + $0x110] ss:$8 sps:$4 sm:$0xff]  }
  0x98   : > { %3019 = vmatpush1.bf16.msra.mxu0 %v4138_v26  ;;  %1301 = vmatprep.subr.bf16.mxu1 %v4143_v33  ;;  %v4165_v26 = vld [vmem:[%s5466_s1 + $0x90] ss:$8 sps:$4 sm:$0xff]   ;;  %v3693_v44 = vld [vmem:[%s4483_s30 + $0x100] sm:$0xff] }
  0x99   : > { %3020 = vmatprep.subr.bf16.mxu0 %v4146_v34  ;;  %880 = vmatprep.mubr.bf16.mxu1 %v3440_v41  ;;  %v4177_v33 = vld [vmem:[%s5466_s1 + $0xb0] ss:$8 sps:$4 sm:$0xff]   ;;  %v5068_v41 = vld [vmem:[%s4483_s30 + $0x60] sm:$0xff] }
  0x9a   : > { %2279 = vmatprep.mubr.bf16.mxu0 %v3600_v59  ;;  %v4180_v34 = vld [vmem:[%s5466_s1 + $0x6b0] ss:$8 sps:$4 sm:$0xff]   ;;  %v2395_v47 = vshrl.u32 %v5068_v41, 16  ;;  %v2398_v48 = vshll.u32 %v5068_v41, 16 }
  0x9b   : > { %1302 = vmatpush1.bf16.msra.mxu1 %v4141_v39  ;;  %v4183_v39 = vld [vmem:[%s5466_s1 + $0xc0] ss:$8 sps:$4 sm:$0xff]   ;;  %v4189_v59 = vld [vmem:[%s5466_s1 + $0xd0] ss:$8 sps:$4 sm:$0xff]  }
  0x9c   : > { %3021 = vmatpush1.bf16.msra.mxu0 %v4144_v40  ;;  %1303 = vmatprep.subr.bf16.mxu1 %v4149_v43  ;;  %v4186_v40 = vld [vmem:[%s5466_s1 + $0x6c0] ss:$8 sps:$4 sm:$0xff]   ;;  %v4191_v43 = vld [vmem:[%s5466_s1 + $0xd4] ss:$8 sps:$4 sm:$0xff]   ;;  %v2400_v54 = vrot.slane %v2398_v48, 5  ;;  %v3697_v48 = vcombine.low %v4993_v13, %v5009_v20 }
  0x9d   : > { %3022 = vmatprep.subr.bf16.mxu0 %v4152_v53  ;;  %v2397_v53 = vrot.slane %v2395_v47, 4  ;;  %v3505_v47 = vcombine.low %v4978_v0, %v4939_v38  ;;  %v2535_v0 = vshrl.u32 %v3693_v44, 16  ;;  %v4218_v13 = vld [vmem:[%s5466_s1 + $0x714] ss:$8 sps:$4 sm:$0xff]  }
  0x9e   : > { %881 = vmatmul.mubr.bf16.gmra.mrb[12].mxu1 %v3439_v60  ;;  %v4192_v60 = vld [vmem:[%s5466_s1 + $0x6d0] ss:$8 sps:$4 sm:$0xff]  }
  0x9f   : > { %2280 = vmatmul.mubr.bf16.gmra.mrb[12].mxu0 %v3599_v62  ;;  %1304 = vmatpush1.bf16.msra.mxu1 %v4147_v58  ;;  %v2432_v58 = vshll.u32 %v3679_v49, 16  ;;  %v2401_v61 = vor.u32 %v2400_v54, %v2397_v53  ;;  %v2429_v62 = vor.u32 %v2428_v56, %v2425_v55  ;;  %v2538_v53 = vshll.u32 %v3693_v44, 16  ;;  %v3668_v44 = vld [vmem:[%s4483_s30 + $0x38] sm:$0x11] }
  0xa0   : > { %3023 = vmatpush1.bf16.msra.mxu0 %v4150_v4  ;;  %1305 = vmatprep.subr.bf16.mxu1 %v4155_v5  ;;  %v4198_v4 = vld [vmem:[%s5466_s1 + $0x6e0] ss:$8 sps:$4 sm:$0xff]  }
  0xa1   : > { %3024 = vmatprep.subr.bf16.mxu0 %v4158_v63  ;;  %1323 = vmatprep.mubr.bf16.mxu1 %v3506_v11  ;;  %v5104_v5 = vld [vmem:[%s4483_s30 + $0xa0] sm:$0xff]  ;;  %v2434_v10 = vrot.slane %v2432_v58, 5  ;;  %v3691_v58 = vld [vmem:[%s4483_s30 + $0xf0] sm:$0x11] }
  0xa2   : > { %3042 = vmatprep.mubr.bf16.mxu0 %v3698_v21  ;;  %v5107_v63 = vld [vmem:[%s4483_s30 + $0xc0] sm:$0xff]  ;;  %v2451_v11 = vshrl.u32 %v5104_v5, 16  ;;  %v2454_v14 = vshll.u32 %v5104_v5, 16  ;;  %v4206_v21 = vld [vmem:[%s5466_s1 + $0x6f4] ss:$8 sps:$4 sm:$0xff]  }
  0xa3   : > { %1306 = vmatpush1.bf16.msra.mxu1 %v4153_v15  ;;  %v2402_v15 = vrot.slane %v2401_v61, 4  ;;  %v2537_v61 = vrot.slane %v2535_v0, 4 }
  0xa4   : > { %3025 = vmatpush1.bf16.msra.mxu0 %v4156_v16  ;;  %1307 = vmatprep.subr.bf16.mxu1 %v4161_v18  ;;  %v2430_v16 = vrot.slane %v2429_v62, 4  ;;  %v2479_v18 = vshrl.u32 %v5107_v63, 16  ;;  %v2540_v62 = vrot.slane %v2538_v53, 5  ;;  %v2362_v53 = vshll.u32 %v3668_v44, 16  ;;  %v4281_v44 = vld [vmem:[%s5466_s1 + $0x1c4] ss:$8 sps:$4 sm:$0xff]  }
  0xa5   : > { %3026 = vmatprep.subr.bf16.mxu0 %v4164_v19  ;;  %v2482_v19 = vshll.u32 %v5107_v63, 16 }
  0xa7   : > { %1308 = vmatpush1.bf16.msra.mxu1 %v4159_v22  ;;  %v2453_v22 = vrot.slane %v2451_v11, 4 }
  0xa8   : > { %3027 = vmatpush1.bf16.msra.mxu0 %v4162_v23  ;;  %1309 = vmatprep.subr.bf16.mxu1 %v4167_v24  ;;  %v2456_v23 = vrot.slane %v2454_v14, 5  ;;  %v3683_v24 = vld [vmem:[%s4483_s30 + $0xb0] sm:$0x11]  ;;  %v2541_v14 = vor.u32 %v2540_v62, %v2537_v61 }
  0xa9   : > { %3028 = vmatprep.subr.bf16.mxu0 %v4170_v25  ;;  %v3687_v25 = vld [vmem:[%s4483_s30 + $0xd0] sm:$0x11] }
  0xaa   : > { %v4237_v62 = vld [vmem:[%s5466_s1 + $0x150] ss:$8 sps:$4 sm:$0xff]  }
  0xab   : > { %1310 = vmatpush1.bf16.msra.mxu1 %v4165_v26  ;;  %v2481_v26 = vrot.slane %v2479_v18, 4  ;;  %v5193_v18 = vld [vmem:[%s4483_s30 + $0x48] sm:$0xff] }
  0xac   : > { %3029 = vmatpush1.bf16.msra.mxu0 %v4168_v27  ;;  %1311 = vmatprep.subr.bf16.mxu1 %v4173_v28  ;;  %v2484_v27 = vrot.slane %v2482_v19, 5  ;;  %v4201_v28 = vld [vmem:[%s5466_s1 + $0xf0] ss:$8 sps:$4 sm:$0xff]   ;;  %v3509_v19 = vcombine.low %v4959_v46, %v5068_v41 }
  0xad   : > { %3030 = vmatprep.subr.bf16.mxu0 %v4176_v29  ;;  %v4204_v29 = vld [vmem:[%s5466_s1 + $0x6f0] ss:$8 sps:$4 sm:$0xff]  }
  0xaf   : > { %1312 = vmatpush1.bf16.msra.mxu1 %v4171_v30  ;;  %v4209_v30 = vld [vmem:[%s5466_s1 + $0x104] ss:$8 sps:$4 sm:$0xff]  }
  0xb0   : > { %3031 = vmatpush1.bf16.msra.mxu0 %v4174_v6  ;;  %1313 = vmatprep.subr.bf16.mxu1 %v4179_v31  ;;  %v5132_v6 = vsel %vm4530_vm2, %v2402_v15, %v2406_v9  ;;  %v5136_v31 = vsel %vm4530_vm2, %v2430_v16, %v2434_v10  ;;  %v2516_v9 = vshll.u32 %v3691_v58, 16  ;;  %v5190_v16 = vld [vmem:[%s4483_s30 + $0x28] sm:$0xff] }
  0xb1   : > { %3032 = vmatprep.subr.bf16.mxu0 %v4182_v32  ;;  %v4212_v32 = vld [vmem:[%s5466_s1 + $0x704] ss:$8 sps:$4 sm:$0xff]   ;;  %v3702_v38 = vcombine.high %v5132_v6, %v5136_v31 }
  0xb3   : > { %1314 = vmatpush1.bf16.msra.mxu1 %v4177_v33  ;;  %v2457_v33 = vor.u32 %v2456_v23, %v2453_v22  ;;  %v2353_v22 = vshrl.u32 %v5190_v16, 16  ;;  %v4219_v23 = vld [vmem:[%s5466_s1 + $0x120] ss:$8 sps:$4 sm:$0xff]  }
  0xb4   : > { %3033 = vmatpush1.bf16.msra.mxu0 %v4180_v34  ;;  %1315 = vmatprep.subr.bf16.mxu1 %v4185_v36  ;;  %v2460_v34 = vshll.u32 %v3683_v24, 16  ;;  %v2485_v36 = vor.u32 %v2484_v27, %v2481_v26  ;;  %v4222_v24 = vld [vmem:[%s5466_s1 + $0x720] ss:$8 sps:$4 sm:$0xff]   ;;  %v2381_v26 = vshrl.u32 %v5193_v18, 16  ;;  %v3514_v27 = vcombine.high %v5071_v42, %v5104_v5 }
  0xb5   : > { %3034 = vmatprep.subr.bf16.mxu0 %v4188_v37  ;;  %v2488_v37 = vshll.u32 %v3687_v25, 16  ;;  %v2458_v20 = vrot.slane %v2457_v33, 4  ;;  %v2356_v25 = vshll.u32 %v5190_v16, 16  ;;  %v4225_v33 = vld [vmem:[%s5466_s1 + $0x130] ss:$8 sps:$4 sm:$0xff]  }
  0xb6   : > { %v2462_v54 = vrot.slane %v2460_v34, 5  ;;  %v2486_v55 = vrot.slane %v2485_v36, 4  ;;  %v2355_v34 = vrot.slane %v2353_v22, 4  ;;  %v4249_v22 = vld [vmem:[%s5466_s1 + $0x170] ss:$8 sps:$4 sm:$0xff]  }
  0xb7   : > { %1316 = vmatpush1.bf16.msra.mxu1 %v4183_v39  ;;  %v5142_v39 = vld [vmem:[%s4483_s30 + $0xe0] sm:$0xff]  ;;  %v2490_v56 = vrot.slane %v2488_v37, 5  ;;  %v2358_v36 = vrot.slane %v2356_v25, 5  ;;  %v2383_v37 = vrot.slane %v2381_v26, 4 }
  0xb8   : > { %3035 = vmatpush1.bf16.msra.mxu0 %v4186_v40  ;;  %1317 = vmatprep.subr.bf16.mxu1 %v4191_v43  ;;  %v4207_v40 = vld [vmem:[%s5466_s1 + $0x100] ss:$8 sps:$4 sm:$0xff]   ;;  %v2507_v49 = vshrl.u32 %v5142_v39, 16  ;;  %v2510_v50 = vshll.u32 %v5142_v39, 16  ;;  %v4260_v25 = vld [vmem:[%s5466_s1 + $0x784] ss:$8 sps:$4 sm:$0xff]  }
  0xb9   : > { %3036 = vmatprep.subr.bf16.mxu0 %v4194_v52  ;;  %v4210_v43 = vld [vmem:[%s5466_s1 + $0x700] ss:$8 sps:$4 sm:$0xff]   ;;  %v3510_v52 = vcombine.high %v4959_v46, %v5068_v41  ;;  %v5187_v10 = vsel %vm4530_vm2, %v2486_v55, %v2490_v56  ;;  %v4227_v46 = vld [vmem:[%s5466_s1 + $0x134] ss:$8 sps:$4 sm:$0xff]   ;;  %v2359_v0 = vor.u32 %v2358_v36, %v2355_v34  ;;  %v3518_v56 = vcombine.high %v5107_v63, %v5142_v39 }
  0xba   : > { %v4230_v41 = vld [vmem:[%s5466_s1 + $0x734] ss:$8 sps:$4 sm:$0xff]   ;;  %v4255_v26 = vld [vmem:[%s5466_s1 + $0x180] ss:$8 sps:$4 sm:$0xff]  }
  0xbb   : > { %1318 = vmatpush1.bf16.msra.mxu1 %v4189_v59  ;;  %v2509_v59 = vrot.slane %v2507_v49, 4  ;;  %v4236_v49 = vld [vmem:[%s5466_s1 + $0x744] ss:$8 sps:$4 sm:$0xff]   ;;  %v4242_v55 = vld [vmem:[%s5466_s1 + $0x754] ss:$8 sps:$4 sm:$0xff]   ;;  %v2360_v58 = vrot.slane %v2359_v0, 4 }
  0xbc   : > { %3037 = vmatpush1.bf16.msra.mxu0 %v4192_v60  ;;  %1319 = vmatprep.subr.bf16.mxu1 %v4197_v1  ;;  %v2512_v60 = vrot.slane %v2510_v50, 5  ;;  %v3695_v1 = vld [vmem:[%s4483_s30 + $0x110] sm:$0x11]  ;;  %v3513_v50 = vcombine.low %v5071_v42, %v5104_v5  ;;  %v4231_v42 = vld [vmem:[%s5466_s1 + $0x140] ss:$8 sps:$4 sm:$0xff]  }
  0xbd   : > { %3038 = vmatprep.subr.bf16.mxu0 %v4200_v2  ;;  %v4216_v2 = vld [vmem:[%s5466_s1 + $0x710] ss:$8 sps:$4 sm:$0xff]   ;;  %v2544_v15 = vshll.u32 %v3695_v1, 16  ;;  %v4234_v5 = vld [vmem:[%s5466_s1 + $0x740] ss:$8 sps:$4 sm:$0xff]  }
  0xbe   : > { %v2513_v11 = vor.u32 %v2512_v60, %v2509_v59  ;;  %v2364_v59 = vrot.slane %v2362_v53, 5  ;;  %v4240_v1 = vld [vmem:[%s5466_s1 + $0x750] ss:$8 sps:$4 sm:$0xff]   ;;  %v4278_v34 = vld [vmem:[%s5466_s1 + $0x7b4] ss:$8 sps:$4 sm:$0xff]   ;;  %v5345_v36 = vld [vmem:[%s4483_s30 + $0x68] sm:$0xff] }
  0xbf   : > { %1320 = vmatpush1.bf16.msra.mxu1 %v4195_v3  ;;  %v4221_v3 = vld [vmem:[%s5466_s1 + $0x124] ss:$8 sps:$4 sm:$0xff]   ;;  %v4287_v0 = vld [vmem:[%s5466_s1 + $0x1d4] ss:$8 sps:$4 sm:$0xff]  }
  0xc0   : > { %3039 = vmatpush1.bf16.msra.mxu0 %v4198_v4  ;;  %1321 = vmatprep.subr.bf16.mxu1 %v4203_v7  ;;  %v4224_v4 = vld [vmem:[%s5466_s1 + $0x724] ss:$8 sps:$4 sm:$0xff]   ;;  %v5183_v7 = vsel %vm4530_vm2, %v2458_v20, %v2462_v54  ;;  %v4239_v54 = vld [vmem:[%s5466_s1 + $0x154] ss:$8 sps:$4 sm:$0xff]  }
  0xc1   : > { %3040 = vmatprep.subr.bf16.mxu0 %v4206_v21  ;;  %v3701_v21 = vcombine.low %v5132_v6, %v5136_v31  ;;  %v2518_v6 = vrot.slane %v2516_v9, 5  ;;  %v2542_v31 = vrot.slane %v2541_v14, 4  ;;  %v5270_v9 = vld [vmem:[%s4483_s30 + $0x8] sm:$0xff]  ;;  %v4290_v53 = vld [vmem:[%s5466_s1 + $0x7d4] ss:$8 sps:$4 sm:$0xff]  }
  0xc2   : > { %v4243_v14 = vld [vmem:[%s5466_s1 + $0x160] ss:$8 sps:$4 sm:$0xff]  }
  0xc3   : > { %1322 = vmatpush1.bf16.msra.mxu1 %v4201_v28  ;;  %v3706_v28 = vcombine.high %v5183_v7, %v5187_v10 }
  0xc4   : > { %3041 = vmatpush1.bf16.msra.mxu0 %v4204_v29  ;;  %1364 = vmatprep.subr.bf16.mxu1 %v4209_v30  ;;  %v2384_v29 = vshll.u32 %v5193_v18, 16  ;;  %v2514_v30 = vrot.slane %v2513_v11, 4 }
  0xc5   : > { %3083 = vmatprep.subr.bf16.mxu0 %v4212_v32  ;;  %v2546_v32 = vrot.slane %v2544_v15, 5  ;;  %v4254_v15 = vld [vmem:[%s5466_s1 + $0x774] ss:$8 sps:$4 sm:$0xff]  }
  0xc6   : > { %1324 = vmatmul.mubr.bf16.vlgmr.msra.gmra.mrb[0].mxu1 %v3505_v47  ;;  %v3672_v47 = vld [vmem:[%s4483_s30 + $0x58] sm:$0x11] }
  0xc7   : > { %3043 = vmatmul.mubr.bf16.vlgmr.msra.gmra.mrb[0].mxu0 %v3697_v48  ;;  %1365 = vmatpush1.bf16.msra.mxu1 %v4207_v40  ;;  %v2386_v40 = vrot.slane %v2384_v29, 5  ;;  %v4233_v48 = vld [vmem:[%s5466_s1 + $0x144] ss:$8 sps:$4 sm:$0xff]   ;;  %v2390_v20 = vshll.u32 %v3672_v47, 16  ;;  %v4264_v29 = vld [vmem:[%s5466_s1 + $0x790] ss:$8 sps:$4 sm:$0xff]  }
  0xc8   : > { %3084 = vmatpush1.bf16.msra.mxu0 %v4210_v43  ;;  %1366 = vmatprep.subr.bf16.mxu1 %v4215_v51  ;;  %v4228_v43 = vld [vmem:[%s5466_s1 + $0x730] ss:$8 sps:$4 sm:$0xff]   ;;  %v3705_v51 = vcombine.low %v5183_v7, %v5187_v10  ;;  %v5274_v10 = vsel %vm4530_vm2, %v2360_v58, %v2364_v59  ;;  %v4284_v47 = vld [vmem:[%s5466_s1 + $0x7c4] ss:$8 sps:$4 sm:$0xff]  }
  0xc9   : > { %3085 = vmatprep.subr.bf16.mxu0 %v4218_v13  ;;  %1333 = vmatprep.mubr.bf16.mxu1 %v3510_v52  ;;  %v2519_v52 = vsel %vm4530_vm2, %v2514_v30, %v2518_v6  ;;  %v2387_v13 = vor.u32 %v2386_v40, %v2383_v37  ;;  %v2392_v61 = vrot.slane %v2390_v20, 5  ;;  %v4269_v30 = vld [vmem:[%s5466_s1 + $0x1a4] ss:$8 sps:$4 sm:$0xff]   ;;  %v4273_v40 = vld [vmem:[%s5466_s1 + $0x1b0] ss:$8 sps:$4 sm:$0xff]  }
  0xca   : > { %3052 = vmatprep.mubr.bf16.mxu0 %v3702_v38  ;;  %v2547_v38 = vsel %vm4530_vm2, %v2542_v31, %v2546_v32  ;;  %v4272_v6 = vld [vmem:[%s5466_s1 + $0x7a4] ss:$8 sps:$4 sm:$0xff]   ;;  %v4267_v31 = vld [vmem:[%s5466_s1 + $0x1a0] ss:$8 sps:$4 sm:$0xff]  }
  0xcb   : > { %1367 = vmatpush1.bf16.msra.mxu1 %v4213_v57  ;;  %v3710_v57 = vcombine.high %v2519_v52, %v2547_v38  ;;  %v2388_v60 = vrot.slane %v2387_v13, 4  ;;  %v3709_v7 = vcombine.low %v2519_v52, %v2547_v38  ;;  %v4270_v32 = vld [vmem:[%s5466_s1 + $0x7a0] ss:$8 sps:$4 sm:$0xff]   ;;  %v4293_v58 = vld [vmem:[%s5466_s1 + $0x1e4] ss:$8 sps:$4 sm:$0xff]  }
  0xcc   : > { %3086 = vmatpush1.bf16.msra.mxu0 %v4216_v2  ;;  %1368 = vmatprep.subr.bf16.mxu1 %v4221_v3  ;;  %v4245_v2 = vld [vmem:[%s5466_s1 + $0x164] ss:$8 sps:$4 sm:$0xff]   ;;  %v4279_v52 = vld [vmem:[%s5466_s1 + $0x1c0] ss:$8 sps:$4 sm:$0xff]  }
  0xcd   : > { %3087 = vmatprep.subr.bf16.mxu0 %v4224_v4  ;;  %v4248_v3 = vld [vmem:[%s5466_s1 + $0x764] ss:$8 sps:$4 sm:$0xff]   ;;  %v3517_v4 = vcombine.low %v5107_v63, %v5142_v39  ;;  %v5278_v11 = vsel %vm4530_vm2, %v2388_v60, %v2392_v61  ;;  %v4246_v63 = vld [vmem:[%s5466_s1 + $0x760] ss:$8 sps:$4 sm:$0xff]   ;;  %v4251_v39 = vld [vmem:[%s5466_s1 + $0x174] ss:$8 sps:$4 sm:$0xff]  }
  0xce   : > { %1334 = vmatmul.mubr.bf16.gmra.mrb[4].mxu1 %v3509_v19  ;;  %v3508_v19 = vcombine.high %v5270_v9, %v5190_v16  ;;  %v5348_v37 = vld [vmem:[%s4483_s30 + $0x88] sm:$0xff] }
  0xcf   : > { %3053 = vmatmul.mubr.bf16.gmra.mrb[4].mxu0 %v3701_v21  ;;  %1369 = vmatpush1.bf16.msra.mxu1 %v4219_v23  ;;  %v3700_v21 = vcombine.high %v5274_v10, %v5278_v11  ;;  %v4252_v23 = vld [vmem:[%s5466_s1 + $0x770] ss:$8 sps:$4 sm:$0xff]   ;;  %v4282_v38 = vld [vmem:[%s5466_s1 + $0x7c0] ss:$8 sps:$4 sm:$0xff]   ;;  %v4296_v59 = vld [vmem:[%s5466_s1 + $0x7e4] ss:$8 sps:$4 sm:$0xff]  }
  0xd0   : > { %3088 = vmatpush1.bf16.msra.mxu0 %v4222_v24  ;;  %1370 = vmatprep.subr.bf16.mxu1 %v4227_v46  ;;  %v4257_v24 = vld [vmem:[%s5466_s1 + $0x184] ss:$8 sps:$4 sm:$0xff]   ;;  %v4258_v46 = vld [vmem:[%s5466_s1 + $0x780] ss:$8 sps:$4 sm:$0xff]  }
  0xd1   : > { %3089 = vmatprep.subr.bf16.mxu0 %v4230_v41  ;;  %1343 = vmatprep.mubr.bf16.mxu1 %v3514_v27  ;;  %v4263_v41 = vld [vmem:[%s5466_s1 + $0x194] ss:$8 sps:$4 sm:$0xff]  }
  0xd2   : > { %3062 = vmatprep.mubr.bf16.mxu0 %v3706_v28  ;;  %v4266_v27 = vld [vmem:[%s5466_s1 + $0x794] ss:$8 sps:$4 sm:$0xff]   ;;  %v4261_v28 = vld [vmem:[%s5466_s1 + $0x190] ss:$8 sps:$4 sm:$0xff]  }
  0xd3   : > { %1371 = vmatpush1.bf16.msra.mxu1 %v4225_v33  ;;  %v4275_v33 = vld [vmem:[%s5466_s1 + $0x1b4] ss:$8 sps:$4 sm:$0xff]  }
  0xd4   : > { %3090 = vmatpush1.bf16.msra.mxu0 %v4228_v43  ;;  %1372 = vmatprep.subr.bf16.mxu1 %v4233_v48  ;;  %v4276_v43 = vld [vmem:[%s5466_s1 + $0x7b0] ss:$8 sps:$4 sm:$0xff]   ;;  %v2409_v48 = vshrl.u32 %v5345_v36, 16 }
  0xd5   : > { %3091 = vmatprep.subr.bf16.mxu0 %v4236_v49  ;;  %v2412_v49 = vshll.u32 %v5345_v36, 16 }
  0xd6   : > { %1344 = vmatmul.mubr.bf16.gmra.mrb[8].mxu1 %v3513_v50  ;;  %v2437_v50 = vshrl.u32 %v5348_v37, 16  ;;  %v2411_v13 = vrot.slane %v2409_v48, 4  ;;  %v4303_v48 = vld [vmem:[%s4483_s30 + $0xa8] sm:$0xff] }
  0xd7   : > { %3063 = vmatmul.mubr.bf16.gmra.mrb[8].mxu0 %v3705_v51  ;;  %1373 = vmatpush1.bf16.msra.mxu1 %v4231_v42  ;;  %v2440_v51 = vshll.u32 %v5348_v37, 16  ;;  %v2414_v20 = vrot.slane %v2412_v49, 5  ;;  %v3516_v49 = vcombine.high %v5348_v37, %v4303_v48 }
  0xd8   : > { %3092 = vmatpush1.bf16.msra.mxu0 %v4234_v5  ;;  %1374 = vmatprep.subr.bf16.mxu1 %v4239_v54  ;;  %v2439_v42 = vrot.slane %v2437_v50, 4  ;;  %v3676_v54 = vld [vmem:[%s4483_s30 + $0x78] sm:$0x11] }
  0xd9   : > { %3093 = vmatprep.subr.bf16.mxu0 %v4242_v55  ;;  %1353 = vmatprep.mubr.bf16.mxu1 %v3518_v56  ;;  %v2442_v5 = vrot.slane %v2440_v51, 5  ;;  %v3680_v55 = vld [vmem:[%s4483_s30 + $0x98] sm:$0x11]  ;;  %v2415_v60 = vor.u32 %v2414_v20, %v2411_v13  ;;  %v2418_v61 = vshll.u32 %v3676_v54, 16 }
  0xda   : > { %3072 = vmatprep.mubr.bf16.mxu0 %v3710_v57  ;;  %v4285_v56 = vld [vmem:[%s5466_s1 + $0x1d0] ss:$8 sps:$4 sm:$0xff]  }
  0xdb   : > { %1375 = vmatpush1.bf16.msra.mxu1 %v4237_v62  ;;  %v4288_v57 = vld [vmem:[%s5466_s1 + $0x7d0] ss:$8 sps:$4 sm:$0xff]   ;;  %v2443_v62 = vor.u32 %v2442_v5, %v2439_v42 }
  0xdc   : > { %3094 = vmatpush1.bf16.msra.mxu0 %v4240_v1  ;;  %1376 = vmatprep.subr.bf16.mxu1 %v4245_v2  ;;  %v2446_v1 = vshll.u32 %v3680_v55, 16  ;;  %v4291_v2 = vld [vmem:[%s5466_s1 + $0x1e0] ss:$8 sps:$4 sm:$0xff]  }
  0xdd   : > { %3095 = vmatprep.subr.bf16.mxu0 %v4248_v3  ;;  %v4294_v3 = vld [vmem:[%s5466_s1 + $0x7e0] ss:$8 sps:$4 sm:$0xff]  }
  0xde   : > { %1354 = vmatmul.mubr.bf16.gmra.mrb[12].mxu1 %v3517_v4  ;;  %v4299_v4 = vld [vmem:[%s5466_s1 + $0x1f4] ss:$8 sps:$4 sm:$0xff]  }
  0xdf   : > { %3073 = vmatmul.mubr.bf16.gmra.mrb[12].mxu0 %v3709_v7  ;;  %1377 = vmatpush1.bf16.msra.mxu1 %v4243_v14  ;;  %v4302_v7 = vld [vmem:[%s5466_s1 + $0x7f4] ss:$8 sps:$4 sm:$0xff]   ;;  %v2416_v14 = vrot.slane %v2415_v60, 4 }
  0xe0   : > { %3096 = vmatpush1.bf16.msra.mxu0 %v4246_v63  ;;  %1378 = vmatprep.subr.bf16.mxu1 %v4251_v39  ;;  %v2420_v63 = vrot.slane %v2418_v61, 5  ;;  %v2444_v39 = vrot.slane %v2443_v62, 4 }
  0xe1   : > { %3097 = vmatprep.subr.bf16.mxu0 %v4254_v15  ;;  %1396 = vmatprep.mubr.bf16.mxu1 %v3508_v19  ;;  %v2448_v15 = vrot.slane %v2446_v1, 5  ;;  %v3684_v19 = vld [vmem:[%s4483_s30 + $0xb8] sm:$0x11] }
  0xe2   : > { %3115 = vmatprep.mubr.bf16.mxu0 %v3700_v21  ;;  %v3688_v21 = vld [vmem:[%s4483_s30 + $0xd8] sm:$0x11] }
  0xe3   : > { %1379 = vmatpush1.bf16.msra.mxu1 %v4249_v22  ;;  %v4297_v22 = vld [vmem:[%s5466_s1 + $0x1f0] ss:$8 sps:$4 sm:$0xff]  }
  0xe4   : > { %3098 = vmatpush1.bf16.msra.mxu0 %v4252_v23  ;;  %1380 = vmatprep.subr.bf16.mxu1 %v4257_v24  ;;  %v4300_v23 = vld [vmem:[%s5466_s1 + $0x7f0] ss:$8 sps:$4 sm:$0xff]   ;;  %v2549_v24 = vshrl.u32 %v4928_v12, 16 }
  0xe5   : > { %3099 = vmatprep.subr.bf16.mxu0 %v4260_v25  ;;  %v2552_v25 = vshll.u32 %v4928_v12, 16  ;;  %v3512_v12 = vcombine.high %v5193_v18, %v5345_v36 }
  0xe7   : > { %1381 = vmatpush1.bf16.msra.mxu1 %v4255_v26  ;;  %v2421_v26 = vsel %vm4530_vm2, %v2416_v14, %v2420_v63 }
  0xe8   : > { %3100 = vmatpush1.bf16.msra.mxu0 %v4258_v46  ;;  %1382 = vmatprep.subr.bf16.mxu1 %v4263_v41  ;;  %v2449_v46 = vsel %vm4530_vm2, %v2444_v39, %v2448_v15  ;;  %v2474_v41 = vshll.u32 %v3684_v19, 16 }
  0xe9   : > { %3101 = vmatprep.subr.bf16.mxu0 %v4266_v27  ;;  %v2502_v27 = vshll.u32 %v3688_v21, 16 }
  0xeb   : > { %1383 = vmatpush1.bf16.msra.mxu1 %v4261_v28  ;;  %v3507_v28 = vcombine.low %v5270_v9, %v5190_v16 }
  0xec   : > { %3102 = vmatpush1.bf16.msra.mxu0 %v4264_v29  ;;  %1384 = vmatprep.subr.bf16.mxu1 %v4269_v30  ;;  %v3699_v29 = vcombine.low %v5274_v10, %v5278_v11  ;;  %v3704_v30 = vcombine.high %v2421_v26, %v2449_v46 }
  0xed   : > { %3103 = vmatprep.subr.bf16.mxu0 %v4272_v6  ;;  %v2551_v6 = vrot.slane %v2549_v24, 4 }
  0xef   : > { %1385 = vmatpush1.bf16.msra.mxu1 %v4267_v31  ;;  %v2554_v31 = vrot.slane %v2552_v25, 5 }
  0xf0   : > { %3104 = vmatpush1.bf16.msra.mxu0 %v4270_v32  ;;  %1386 = vmatprep.subr.bf16.mxu1 %v4275_v33  ;;  %v2476_v32 = vrot.slane %v2474_v41, 5  ;;  %v2504_v33 = vrot.slane %v2502_v27, 5 }
  0xf1   : > { %3105 = vmatprep.subr.bf16.mxu0 %v4278_v34  ;;  %v3692_v34 = vld [vmem:[%s4483_s30 + $0xf8] sm:$0x11]  ;;  %v2555_v16 = vor.u32 %v2554_v31, %v2551_v6 }
  0xf2   : > { %v2477_v9 = vsel %vm4530_vm2, %v4910_v17, %v2476_v32  ;;  %v2505_v10 = vsel %vm4530_vm2, %v4936_v35, %v2504_v33  ;;  %v2530_v11 = vshll.u32 %v3692_v34, 16  ;;  %v197_v17 = vld [vmem:[%s4483_s30 + $0xc8] sm:$0xff] }
  0xf3   : > { %1387 = vmatpush1.bf16.msra.mxu1 %v4273_v40  ;;  %v3696_v40 = vld [vmem:[%s4483_s30 + $0x118] sm:$0x11]  ;;  %v3708_v50 = vcombine.high %v2477_v9, %v2505_v10 }
  0xf4   : > { %3106 = vmatpush1.bf16.msra.mxu0 %v4276_v43  ;;  %1388 = vmatprep.subr.bf16.mxu1 %v4281_v44  ;;  %v2558_v43 = vshll.u32 %v3696_v40, 16  ;;  %v3511_v44 = vcombine.low %v5193_v18, %v5345_v36  ;;  %v2532_v51 = vrot.slane %v2530_v11, 5  ;;  %v3515_v36 = vcombine.low %v5348_v37, %v4303_v48 }
  0xf5   : > { %3107 = vmatprep.subr.bf16.mxu0 %v4284_v47  ;;  %v3703_v47 = vcombine.low %v2421_v26, %v2449_v46 }
  0xf6   : > { %v2533_v35 = vsel %vm4530_vm2, %v4956_v45, %v2532_v51 }
  0xf7   : > { %1389 = vmatpush1.bf16.msra.mxu1 %v4279_v52  ;;  %v2556_v52 = vrot.slane %v2555_v16, 4 }
  0xf8   : > { %3108 = vmatpush1.bf16.msra.mxu0 %v4282_v38  ;;  %1390 = vmatprep.subr.bf16.mxu1 %v4287_v0  ;;  %v2560_v38 = vrot.slane %v2558_v43, 5  ;;  %v3707_v0 = vcombine.low %v2477_v9, %v2505_v10 }
  0xf9   : > { %3109 = vmatprep.subr.bf16.mxu0 %v4290_v53  ;;  %v4304_v53 = vld [vmem:[%s4483_s30 + $0xe8] sm:$0xff] }
  0xfa   : > { %v2561_v18 = vsel %vm4530_vm2, %v2556_v52, %v2560_v38  ;;  %v3520_v13 = vcombine.high %v197_v17, %v4304_v53  ;;  %v3519_v42 = vcombine.low %v197_v17, %v4304_v53 }
  0xfb   : > { %1391 = vmatpush1.bf16.msra.mxu1 %v4285_v56  ;;  %v3712_v20 = vcombine.high %v2533_v35, %v2561_v18  ;;  %v3711_v5 = vcombine.low %v2533_v35, %v2561_v18 }
  0xfc   : > { %3110 = vmatpush1.bf16.msra.mxu0 %v4288_v57  ;;  %1392 = vmatprep.subr.bf16.mxu1 %v4293_v58 }
  0xfd   : > { %3111 = vmatprep.subr.bf16.mxu0 %v4296_v59 }
  0xff   : > { %1393 = vmatpush1.bf16.msra.mxu1 %v4291_v2 }
 0x100   : > { %3112 = vmatpush1.bf16.msra.mxu0 %v4294_v3  ;;  %1394 = vmatprep.subr.bf16.mxu1 %v4299_v4 }
 0x101   : > { %3113 = vmatprep.subr.bf16.mxu0 %v4302_v7 }
 0x103   : > { %1395 = vmatpush1.bf16.msra.mxu1 %v4297_v22 }
 0x104   : > { %3114 = vmatpush1.bf16.msra.mxu0 %v4300_v23 }
 0x106   : > { %1397 = vmatmul.mubr.bf16.vlgmr.msra.gmra.mrb[0].mxu1 %v3507_v28 }
 0x107   : > { %3116 = vmatmul.mubr.bf16.vlgmr.msra.gmra.mrb[0].mxu0 %v3699_v29  ;;  %1406 = vmatprep.mubr.bf16.mxu1 %v3512_v12 }
 0x108   : > { %3125 = vmatprep.mubr.bf16.mxu0 %v3704_v30 }
 0x10e   : > { %1407 = vmatmul.mubr.bf16.gmra.mrb[4].mxu1 %v3511_v44 }
 0x10f   : > { %3126 = vmatmul.mubr.bf16.gmra.mrb[4].mxu0 %v3703_v47  ;;  %1416 = vmatprep.mubr.bf16.mxu1 %v3516_v49 }
 0x110   : > { %3135 = vmatprep.mubr.bf16.mxu0 %v3708_v50 }
 0x116   : > { %1417 = vmatmul.mubr.bf16.gmra.mrb[8].mxu1 %v3515_v36 }
 0x117   : > { %3136 = vmatmul.mubr.bf16.gmra.mrb[8].mxu0 %v3707_v0  ;;  %1426 = vmatprep.mubr.bf16.mxu1 %v3520_v13 }
 0x118   : > { %3145 = vmatprep.mubr.bf16.mxu0 %v3712_v20 }
 0x11e   : > { %1427 = vmatmul.mubr.bf16.gmra.mrb[12].mxu1 %v3519_v42 }
 0x11f   : > { %3146 = vmatmul.mubr.bf16.gmra.mrb[12].mxu0 %v3711_v5 }
 0x1d9   : > { %v1398_v54 = vpop.f32.mrb[0].mxu1 }
 0x1da   : > { %v3117_v45 = vpop.f32.mrb[0].mxu0  ;;  %v1400_v55 = vpop.f32.mrb[1].mxu1 }
 0x1db   : > { %v3798_v8 = vadd.f32 %v3117_v45, %v1398_v54  ;;  %v3119_v56 = vpop.f32.mrb[1].mxu0  ;;  %v1402_v37 = vpop.f32.mrb[2].mxu1 }
 0x1dc   : > { %v3799_v57 = vadd.f32 %v3119_v56, %v1400_v55  ;;  %v3121_v58 = vpop.f32.mrb[2].mxu0  ;;  %v1404_v60 = vpop.f32.mrb[3].mxu1 }
 0x1dd   : > { %v3800_v59 = vadd.f32 %v3121_v58, %v1402_v37  ;;  %v3123_v61 = vpop.f32.mrb[3].mxu0  ;;  %v3254_v2 = vmul.f32 %v3798_v8, %v3798_v8 }
 0x1de   : > { %v3790_v62 = vpack.c.bf16 %v3799_v57, %v3798_v8  ;;  %v3801_v1 = vadd.f32 %v3123_v61, %v1404_v60  ;;  %v3255_v7 = vmul.f32 %v3799_v57, %v3799_v57 }
 0x1df   : > { %v3228_v3 = vadd.f32 %v3800_v59, %v3798_v8  ;;  %v3256_v4 = vmul.f32 %v3800_v59, %v3800_v59 }
 0x1e0   : > { %3220 = vst [vmem:[%s5448_s24] sm:$0xff] %v3790_v62  ;;  %v3791_v14 = vpack.c.bf16 %v3801_v1, %v3800_v59  ;;  %v3241_v63 = vadd.f32 %v3801_v1, %v3799_v57  ;;  %v3257_v39 = vmul.f32 %v3801_v1, %v3801_v1 }
 0x1e1   : > { %v3270_v15 = vadd.f32 %v3256_v4, %v3254_v2  ;;  %v1408_v21 = vpop.f32.mrb[4].mxu1 }
 0x1e2   : > { %3221 = vst [vmem:[%s5448_s24 + $0x8] sm:$0xff] %v3791_v14  ;;  %v3283_v19 = vadd.f32 %v3257_v39, %v3255_v7  ;;  %v3127_v22 = vpop.f32.mrb[4].mxu0  ;;  %v1410_v24 = vpop.f32.mrb[5].mxu1 }
 0x1e3   : > { %v3802_v23 = vadd.f32 %v3127_v22, %v1408_v21  ;;  %v3129_v25 = vpop.f32.mrb[5].mxu0  ;;  %v1412_v46 = vpop.f32.mrb[6].mxu1 }
 0x1e4   : > { %v3803_v26 = vadd.f32 %v3129_v25, %v1410_v24  ;;  %v3131_v41 = vpop.f32.mrb[6].mxu0  ;;  %v1414_v12 = vpop.f32.mrb[7].mxu1 }
 0x1e5   : > { %v3229_v27 = vadd.f32 %v3802_v23, %v3228_v3  ;;  %v3258_v28 = vmul.f32 %v3802_v23, %v3802_v23  ;;  %v3804_v29 = vadd.f32 %v3131_v41, %v1412_v46  ;;  %v3133_v30 = vpop.f32.mrb[7].mxu0 }
 0x1e6   : > { %v3792_v6 = vpack.c.bf16 %v3803_v26, %v3802_v23  ;;  %v3242_v31 = vadd.f32 %v3803_v26, %v3241_v63  ;;  %v3259_v32 = vmul.f32 %v3803_v26, %v3803_v26  ;;  %v3805_v33 = vadd.f32 %v3133_v30, %v1414_v12 }
 0x1e7   : > { %v3271_v34 = vadd.f32 %v3270_v15, %v3258_v28  ;;  %v3230_v40 = vadd.f32 %v3804_v29, %v3229_v27  ;;  %v3260_v16 = vmul.f32 %v3804_v29, %v3804_v29 }
 0x1e8   : > { %3222 = vst [vmem:[%s5448_s24 + $0x10] sm:$0xff] %v3792_v6  ;;  %v3284_v9 = vadd.f32 %v3283_v19, %v3259_v32  ;;  %v3793_v10 = vpack.c.bf16 %v3805_v33, %v3804_v29  ;;  %v3243_v11 = vadd.f32 %v3805_v33, %v3242_v31  ;;  %v3261_v43 = vmul.f32 %v3805_v33, %v3805_v33 }
 0x1e9   : > { %v3272_v44 = vadd.f32 %v3271_v34, %v3260_v16  ;;  %v1418_v48 = vpop.f32.mrb[8].mxu1 }
 0x1ea   : > { %3223 = vst [vmem:[%s5448_s24 + $0x18] sm:$0xff] %v3793_v10  ;;  %v3285_v47 = vadd.f32 %v3284_v9, %v3261_v43  ;;  %v3137_v49 = vpop.f32.mrb[8].mxu0  ;;  %v1420_v51 = vpop.f32.mrb[9].mxu1 }
 0x1eb   : > { %v3806_v50 = vadd.f32 %v3137_v49, %v1418_v48  ;;  %v3139_v52 = vpop.f32.mrb[9].mxu0  ;;  %v1422_v17 = vpop.f32.mrb[10].mxu1 }
 0x1ec   : > { %v3807_v38 = vadd.f32 %v3139_v52, %v1420_v51  ;;  %v3141_v35 = vpop.f32.mrb[10].mxu0  ;;  %v1424_v53 = vpop.f32.mrb[11].mxu1 }
 0x1ed   : > { %v3231_v18 = vadd.f32 %v3806_v50, %v3230_v40  ;;  %v3262_v36 = vmul.f32 %v3806_v50, %v3806_v50  ;;  %v3808_v0 = vadd.f32 %v3141_v35, %v1422_v17  ;;  %v3143_v13 = vpop.f32.mrb[11].mxu0 }
 0x1ee   : > { %v3794_v20 = vpack.c.bf16 %v3807_v38, %v3806_v50  ;;  %v3244_v42 = vadd.f32 %v3807_v38, %v3243_v11  ;;  %v3263_v5 = vmul.f32 %v3807_v38, %v3807_v38  ;;  %v3809_v54 = vadd.f32 %v3143_v13, %v1424_v53 }
 0x1ef   : > { %v3273_v45 = vadd.f32 %v3272_v44, %v3262_v36  ;;  %v3232_v8 = vadd.f32 %v3808_v0, %v3231_v18  ;;  %v3264_v55 = vmul.f32 %v3808_v0, %v3808_v0 }
 0x1f0   : > { %3224 = vst [vmem:[%s5448_s24 + $0x20] sm:$0xff] %v3794_v20  ;;  %v3286_v56 = vadd.f32 %v3285_v47, %v3263_v5  ;;  %v3795_v57 = vpack.c.bf16 %v3809_v54, %v3808_v0  ;;  %v3245_v37 = vadd.f32 %v3809_v54, %v3244_v42  ;;  %v3265_v58 = vmul.f32 %v3809_v54, %v3809_v54 }
 0x1f1   : > { %v3274_v59 = vadd.f32 %v3273_v45, %v3264_v55  ;;  %v1428_v61 = vpop.f32.mrb[12].mxu1 }
 0x1f2   : > { %3225 = vst [vmem:[%s5448_s24 + $0x28] sm:$0xff] %v3795_v57  ;;  %v3287_v60 = vadd.f32 %v3286_v56, %v3265_v58  ;;  %v3147_v62 = vpop.f32.mrb[12].mxu0  ;;  %v1430_v2 = vpop.f32.mrb[13].mxu1 }
 0x1f3   : > { %v3810_v1 = vadd.f32 %v3147_v62, %v1428_v61  ;;  %v3149_v3 = vpop.f32.mrb[13].mxu0  ;;  %v1432_v7 = vpop.f32.mrb[14].mxu1 }
 0x1f4   : > { %v3811_v4 = vadd.f32 %v3149_v3, %v1430_v2  ;;  %v3151_v14 = vpop.f32.mrb[14].mxu0  ;;  %v1434_v19 = vpop.f32.mrb[15].mxu1 }
 0x1f5   : > { %v3233_v63 = vadd.f32 %v3810_v1, %v3232_v8  ;;  %v3266_v39 = vmul.f32 %v3810_v1, %v3810_v1  ;;  %v3812_v15 = vadd.f32 %v3151_v14, %v1432_v7  ;;  %v3153_v21 = vpop.f32.mrb[15].mxu0 }
 0x1f6   : > { %v3796_v22 = vpack.c.bf16 %v3811_v4, %v3810_v1  ;;  %v3246_v23 = vadd.f32 %v3811_v4, %v3245_v37  ;;  %v3267_v24 = vmul.f32 %v3811_v4, %v3811_v4  ;;  %v3813_v25 = vadd.f32 %v3153_v21, %v1434_v19 }
 0x1f7   : > { %v3275_v26 = vadd.f32 %v3274_v59, %v3266_v39  ;;  %v3234_v46 = vadd.f32 %v3812_v15, %v3233_v63  ;;  %v3268_v41 = vmul.f32 %v3812_v15, %v3812_v15 }
 0x1f8   : > { %3226 = vst [vmem:[%s5448_s24 + $0x30] sm:$0xff] %v3796_v22  ;;  %v3288_v27 = vadd.f32 %v3287_v60, %v3267_v24  ;;  %v3797_v28 = vpack.c.bf16 %v3813_v25, %v3812_v15  ;;  %v3247_v29 = vadd.f32 %v3813_v25, %v3246_v23  ;;  %v3269_v12 = vmul.f32 %v3813_v25, %v3813_v25 }
 0x1f9   : > { %v3235_v30 = vrot.slane %v3234_v46, 4  ;;  %v3276_v6 = vadd.f32 %v3275_v26, %v3268_v41 }
 0x1fa   : > { %3227 = vst [vmem:[%s5448_s24 + $0x38] sm:$0xff] %v3797_v28  ;;  %v3248_v31 = vrot.slane %v3247_v29, 4  ;;  %v3289_v32 = vadd.f32 %v3288_v27, %v3269_v12 }
 0x1fb   : > { %v3236_v33 = vadd.f32 %v3235_v30, %v3234_v46  ;;  %v3277_v34 = vrot.slane %v3276_v6, 4 }
 0x1fc   : > { %v3249_v40 = vadd.f32 %v3248_v31, %v3247_v29  ;;  %v3290_v16 = vrot.slane %v3289_v32, 4 }
 0x1fd   : > { %v3237_v9 = vrot.slane %v3236_v33, 2  ;;  %v3278_v10 = vadd.f32 %v3277_v34, %v3276_v6 }
 0x1fe   : > { %v3250_v11 = vrot.slane %v3249_v40, 2  ;;  %v3291_v43 = vadd.f32 %v3290_v16, %v3289_v32 }
 0x1ff   : > { %v3238_v44 = vadd.f32 %v3237_v9, %v3236_v33  ;;  %v3279_v47 = vrot.slane %v3278_v10, 2 }
 0x200   : > { %v3251_v48 = vadd.f32 %v3250_v11, %v3249_v40  ;;  %v3292_v49 = vrot.slane %v3291_v43, 2 }
 0x201   : > { %v3239_v50 = vrot.slane %v3238_v44, 1  ;;  %v3280_v51 = vadd.f32 %v3279_v47, %v3278_v10 }
 0x202   : > { %v3252_v52 = vrot.slane %v3251_v48, 1  ;;  %v3293_v38 = vadd.f32 %v3292_v49, %v3291_v43 }
 0x203   : > { %v3281_v17 = vrot.slane %v3280_v51, 1  ;;  %v3240_v18 = vadd.f32 %v3239_v50, %v3238_v44 }
 0x204   : > { %v3294_v35 = vrot.slane %v3293_v38, 1  ;;  %v3253_v0 = vadd.f32 %v3252_v52, %v3251_v48 }
 0x205   : > { %v3282_v36 = vadd.f32 %v3281_v17, %v3280_v51 }
 0x206   : > { %v3295_v53 = vadd.f32 %v3294_v35, %v3293_v38 }
 0x207   : > { %v3297_v13 = vsel %vm3296_vm3, %v3240_v18, %v3282_v36 }
 0x208   : > { %v3298_v20 = vsel %vm3296_vm3, %v3253_v0, %v3295_v53 }
 0x209   : > { %v3301_v42 = vcombine.low %v3297_v13, %v3298_v20 }
 0x20b   : > { %3785 = vst.sshfl [vmem:[%s183_s28] sm:$0x33 pattern:$0x76325410] %v3301_v42 }
 0x20c PF: > { %s14_s12 = sadd.s32 1, %s4311_s12  }
 0x20d   : > { %p11_p4 = scmp.ge.s32.totalorder %s14_s12, 4  }
 0x20f   :  { %13 = sbr.rel (!%p11_p4) target bundleno = 1 (0x1), region = 71 }

</bundles_post_ra>
